<compile_context>
chip_gen: v7x
topology: tpu7x:2x2x1
jax: 0.10.0
libtpu: 0.0.40
codegen_flags: <defaults>
</compile_context>

<pallas_src>
import math

import jax
import jax.numpy as jnp
from jax import lax
from jax.experimental import pallas as pl
from jax.experimental.pallas import tpu as pltpu

HIDDEN = 32
NUM_HEADS = 4
HEAD_DIM = HIDDEN // NUM_HEADS
MLP_DIM = 64
LN_EPS = 1e-6
NEG_INF = -1e30


# ----------------------------------------------------------------------------
# In-kernel helpers
# ----------------------------------------------------------------------------
def _layernorm(x, gamma, beta):
    mean = jnp.mean(x, axis=-1, keepdims=True)
    var = jnp.mean(jnp.square(x - mean), axis=-1, keepdims=True)
    return (x - mean) * lax.rsqrt(var + LN_EPS) * gamma + beta


# ----------------------------------------------------------------------------
# Fully fused Block kernel: one grid step == one batch element; everything
# (spatial attn -> temporal attn -> MLP) computed on a resident (S, H) slab.
# ----------------------------------------------------------------------------
def fused_block_kernel(x_ref, masks_ref, hmask_ref, spw_ref, spv_ref,
                       temw_ref, temv_ref, w1_ref, b1_ref, w2_ref, ffnv_ref,
                       o_ref):
    x = x_ref[0]                        # (S, H), t-major token order
    sp_mask = masks_ref[0]              # (S, S) additive: same-frame tokens
    tem_mask = masks_ref[1]             # (S, S) additive: same-spatial-index
    hms = hmask_ref[...]                # (NUM_HEADS, H) 0/1 lane masks
    scale = 1.0 / math.sqrt(HEAD_DIM)

    def attn(xin, w_ref, v_ref, mask_add):
        S = xin.shape[0]
        w = w_ref[...]                  # (4H, H) packed [wq; wk; wv; wo]
        vecs = v_ref[...]               # (6, H)  [gamma, beta, bq, bk, bv, bo]
        gamma, beta = vecs[0:1], vecs[1:2]
        bq, bk, bv, bo = vecs[2:3], vecs[3:4], vecs[4:5], vecs[5:6]
        wq = w[0 * HIDDEN:1 * HIDDEN, :]
        wk = w[1 * HIDDEN:2 * HIDDEN, :]
        wv = w[2 * HIDDEN:3 * HIDDEN, :]
        wo = w[3 * HIDDEN:4 * HIDDEN, :]

        xn = _layernorm(xin, gamma, beta)
        q = jnp.dot(xn, wq, preferred_element_type=jnp.float32) + bq
        k = jnp.dot(xn, wk, preferred_element_type=jnp.float32) + bk
        v = jnp.dot(xn, wv, preferred_element_type=jnp.float32) + bv

        ctx = jnp.zeros((S, HIDDEN), jnp.float32)
        for h in range(NUM_HEADS):      # static unroll over heads
            hm = hms[h:h + 1, :]        # (1, H)
            # (q*hm) @ k^T == q_h @ k_h^T (zeroed lanes contribute exact 0)
            s = lax.dot_general(q * hm, k, (((1,), (1,)), ((), ())),
                                preferred_element_type=jnp.float32) * scale
            s = s + mask_add            # block-diagonal sequence mask
            s = s - jnp.max(s, axis=-1, keepdims=True)
            p = jnp.exp(s)
            p = p / jnp.sum(p, axis=-1, keepdims=True)
            # p_h @ (v*hm) writes head h's context into head h's lanes only.
            ctx = ctx + jnp.dot(p, v * hm, preferred_element_type=jnp.float32)

        out = jnp.dot(ctx, wo, preferred_element_type=jnp.float32) + bo
        return out + xin                # residual

    x1 = attn(x, spw_ref, spv_ref, sp_mask)       # spatial attention block
    x2 = attn(x1, temw_ref, temv_ref, tem_mask)   # temporal attention block

    # FFN: LayerNorm -> fc1 -> exact gelu -> fc2 -> residual, all S tokens.
    fvec = ffnv_ref[...]                # (3, H) [gamma, beta, b2]
    gamma, beta, b2 = fvec[0:1], fvec[1:2], fvec[2:3]
    xn = _layernorm(x2, gamma, beta)
    h1 = jnp.dot(xn, w1_ref[...], preferred_element_type=jnp.float32) + b1_ref[...]
    h1 = 0.5 * h1 * (1.0 + lax.erf(h1 * (1.0 / math.sqrt(2.0))))   # exact gelu
    h2 = jnp.dot(h1, w2_ref[...], preferred_element_type=jnp.float32) + b2
    o_ref[0] = (h2 + x2).astype(o_ref.dtype)


# ----------------------------------------------------------------------------
# Wrapper: parameter packing + mask precompute + single pallas_call
# ----------------------------------------------------------------------------
def _pack_attn(ln, attn):
    g, b = ln
    wq, bq, wk, bk, wv, bv, wo, bo = attn
    w = jnp.concatenate([wq, wk, wv, wo], axis=0)        # (4H, H)
    vec = jnp.stack([g, b, bq, bk, bv, bo], axis=0)      # (6, H)
    return w, vec


def block_forward(x, p):
    b, t, n, H = x.shape
    S = t * n

    spw, spv = _pack_attn(p["sp_ln"], p["sp_attn"])
    temw, temv = _pack_attn(p["tem_ln"], p["tem_attn"])
    fg, fb = p["ffn_ln"]
    w1, b1, w2, b2 = p["ffn"]
    ffnv = jnp.stack([fg, fb, b2], axis=0)               # (3, H)
    b1r = b1.reshape(1, MLP_DIM)

    # Precompute tiny masks host/XLA-side (avoids in-kernel iota & int div/mod,
    # and they are DMA'd only once thanks to constant index_maps).
    tok = jnp.arange(S, dtype=jnp.int32)
    frame = tok // n                                     # which frame
    spat = tok % n                                       # which spatial index
    sp_mask = jnp.where(frame[:, None] == frame[None, :], 0.0, NEG_INF)
    tem_mask = jnp.where(spat[:, None] == spat[None, :], 0.0, NEG_INF)
    seq_masks = jnp.stack([sp_mask, tem_mask], axis=0).astype(jnp.float32)  # (2,S,S)
    lane = jnp.arange(H, dtype=jnp.int32)
    head_masks = (lane[None, :] // HEAD_DIM ==
                  jnp.arange(NUM_HEADS, dtype=jnp.int32)[:, None]
                  ).astype(jnp.float32)                  # (NUM_HEADS, H)

    x_flat = x.reshape(b, S, H)                          # contiguous, free

    def const(shape):
        return pl.BlockSpec(shape, lambda i: (0,) * len(shape))

    out = pl.pallas_call(
        fused_block_kernel,
        out_shape=jax.ShapeDtypeStruct((b, S, H), x.dtype),
        grid=(b,),
        in_specs=[
            pl.BlockSpec((1, S, H), lambda i: (i, 0, 0)),   # x
            const((2, S, S)),                               # sequence masks
            const((NUM_HEADS, H)),                          # head lane masks
            const((4 * H, H)), const((6, H)),               # spatial attn params
            const((4 * H, H)), const((6, H)),               # temporal attn params
            const((H, MLP_DIM)),                            # w1
            const((1, MLP_DIM)),                            # b1
            const((MLP_DIM, H)),                            # w2
            const((3, H)),                                  # ffn ln + b2
        ],
        out_specs=pl.BlockSpec((1, S, H), lambda i: (i, 0, 0)),
        compiler_params=pltpu.CompilerParams(
            dimension_semantics=("parallel",)),
    )(x_flat, seq_masks, head_masks, spw, spv, temw, temv, w1, b1r, w2, ffnv)

    weights = [None, None]   # vis=False in the reference module
    return out.reshape(b, t, n, H), weights


# ----------------------------------------------------------------------------
# Pure-JAX reference for verification
# ----------------------------------------------------------------------------
def _ref_ln(x, g, b):
    m = jnp.mean(x, axis=-1, keepdims=True)
    v = jnp.mean((x - m) ** 2, axis=-1, keepdims=True)
    return (x - m) / jnp.sqrt(v + LN_EPS) * g + b


def _ref_attn(x, ln_g, ln_b, wq, bq, wk, bk, wv, bv, wo, bo):
    B, S, H = x.shape
    xn = _ref_ln(x, ln_g, ln_b)
    def heads(y):
        return y.reshape(B, S, NUM_HEADS, HEAD_DIM).transpose(0, 2, 1, 3)
    q, k, v = heads(xn @ wq + bq), heads(xn @ wk + bk), heads(xn @ wv + bv)
    s = jnp.einsum("bhqd,bhkd->bhqk", q, k) / math.sqrt(HEAD_DIM)
    p = jax.nn.softmax(s, axis=-1)
    ctx = jnp.einsum("bhqk,bhkd->bhqd", p, v).transpose(0, 2, 1, 3).reshape(B, S, H)
    return ctx @ wo + bo + x


def _ref_mlp(x, ln_g, ln_b, w1, b1, w2, b2):
    xn = _ref_ln(x, ln_g, ln_b)
    h = jax.nn.gelu(xn @ w1 + b1, approximate=False)
    return h @ w2 + b2 + x


def ref_forward(x, p):
    b, t, n, H = x.shape
    xs = _ref_attn(x.reshape(b * t, n, H), *p["sp_ln"], *p["sp_attn"])
    xt = _ref_attn(xs.reshape(b, t, n, H).transpose(0, 2, 1, 3).reshape(b * n, t, H),
                   *p["tem_ln"], *p["tem_attn"])
    xf = xt.reshape(b, n, t, H).transpose(0, 2, 1, 3)
    xr = _ref_mlp(xf.reshape(b * t * n, H), *p["ffn_ln"], *p["ffn"])
    return xr.reshape(b, t, n, H)


# ----------------------------------------------------------------------------
# Deterministic parameter init (shapes from the PyTorch module; synthetic values)
# ----------------------------------------------------------------------------
def init_params(key):
    ks = iter(jax.random.split(key, 32))
    def lin(k, din, dout, wscale):
        kw, kb = jax.random.split(k)
        w = jax.random.normal(kw, (din, dout), jnp.float32) * wscale   # (in, out) layout
        b = jax.random.normal(kb, (dout,), jnp.float32) * 1e-3
        return w, b
    def attn_params():
        wq, bq = lin(next(ks), HIDDEN, HIDDEN, 0.05)
        wk, bk = lin(next(ks), HIDDEN, HIDDEN, 0.05)
        wv, bv = lin(next(ks), HIDDEN, HIDDEN, 0.05)
        wo, bo = lin(next(ks), HIDDEN, HIDDEN, 0.05)
        return (wq, bq, wk, bk, wv, bv, wo, bo)
    def ln_params():
        g = 1.0 + 0.01 * jax.random.normal(next(ks), (HIDDEN,), jnp.float32)
        b = 0.01 * jax.random.normal(next(ks), (HIDDEN,), jnp.float32)
        return (g, b)
    w1, b1 = lin(next(ks), HIDDEN, MLP_DIM, 0.05)
    w2, b2 = lin(next(ks), MLP_DIM, HIDDEN, 0.05)
    return {
        "sp_ln": ln_params(), "sp_attn": attn_params(),
        "tem_ln": ln_params(), "tem_attn": attn_params(),
        "ffn_ln": ln_params(), "ffn": (w1, b1, w2, b2),
    }


if __name__ == "__main__":
    key = jax.random.PRNGKey(0)
    kx, kp = jax.random.split(key)
    b, t, n = 2, 4, 8
    x = jax.random.normal(kx, (b, t, n, HIDDEN), jnp.float32)
    params = init_params(kp)

    out, weights = jax.jit(block_forward)(x, params)
    out = jax.block_until_ready(out)

    ref = ref_forward(x, params)
    assert out.shape == (b, t, n, HIDDEN)
    err = float(jnp.max(jnp.abs(out - ref)))
    assert jnp.allclose(out, ref, atol=2e-3, rtol=2e-3), err
    print("KERNEL_OK")
</pallas_src>

<mosaic_0001>
module attributes {stable_mosaic.version = 11 : i64} {
  func.func @fused_block_kernel(%arg0: i32, %arg1: memref<1x32x32xf32, #tpu.memory_space<vmem>>, %arg2: memref<2x32x32xf32, #tpu.memory_space<vmem>>, %arg3: memref<4x32xf32, #tpu.memory_space<vmem>>, %arg4: memref<128x32xf32, #tpu.memory_space<vmem>>, %arg5: memref<6x32xf32, #tpu.memory_space<vmem>>, %arg6: memref<128x32xf32, #tpu.memory_space<vmem>>, %arg7: memref<6x32xf32, #tpu.memory_space<vmem>>, %arg8: memref<32x64xf32, #tpu.memory_space<vmem>>, %arg9: memref<1x64xf32, #tpu.memory_space<vmem>>, %arg10: memref<64x32xf32, #tpu.memory_space<vmem>>, %arg11: memref<3x32xf32, #tpu.memory_space<vmem>>, %arg12: memref<1x32x32xf32, #tpu.memory_space<vmem>>) attributes {dimension_semantics = [#tpu.dimension_semantics<parallel>], iteration_bounds = array<i64: 2>, scalar_prefetch = 0 : i64, scratch_operands = 0 : i64, tpu.core_type = #tpu.core_type<tc>, window_params = [{transform_indices = @transform_0, window_bounds = array<i64: 1, 32, 32>}, {pipeline_mode = #tpu.pipeline_mode<synchronous>, transform_indices = @transform_1, window_bounds = array<i64: 2, 32, 32>}, {pipeline_mode = #tpu.pipeline_mode<synchronous>, transform_indices = @transform_2, window_bounds = array<i64: 4, 32>}, {pipeline_mode = #tpu.pipeline_mode<synchronous>, transform_indices = @transform_3, window_bounds = array<i64: 128, 32>}, {pipeline_mode = #tpu.pipeline_mode<synchronous>, transform_indices = @transform_4, window_bounds = array<i64: 6, 32>}, {pipeline_mode = #tpu.pipeline_mode<synchronous>, transform_indices = @transform_5, window_bounds = array<i64: 128, 32>}, {pipeline_mode = #tpu.pipeline_mode<synchronous>, transform_indices = @transform_6, window_bounds = array<i64: 6, 32>}, {pipeline_mode = #tpu.pipeline_mode<synchronous>, transform_indices = @transform_7, window_bounds = array<i64: 32, 64>}, {pipeline_mode = #tpu.pipeline_mode<synchronous>, transform_indices = @transform_8, window_bounds = array<i64: 1, 64>}, {pipeline_mode = #tpu.pipeline_mode<synchronous>, transform_indices = @transform_9, window_bounds = array<i64: 64, 32>}, {pipeline_mode = #tpu.pipeline_mode<synchronous>, transform_indices = @transform_10, window_bounds = array<i64: 3, 32>}, {transform_indices = @transform_11, window_bounds = array<i64: 1, 32, 32>}]} {
    %c0 = arith.constant 0 : index
    %c0_0 = arith.constant 0 : index
    %c0_1 = arith.constant 0 : index
    %0 = vector.load %arg1[%c0, %c0_0, %c0_1] : memref<1x32x32xf32, #tpu.memory_space<vmem>>, vector<1x32x32xf32>
    %1 = vector.shape_cast %0 : vector<1x32x32xf32> to vector<32x32xf32>
    %c0_2 = arith.constant 0 : index
    %c0_3 = arith.constant 0 : index
    %c0_4 = arith.constant 0 : index
    %2 = vector.load %arg2[%c0_2, %c0_3, %c0_4] : memref<2x32x32xf32, #tpu.memory_space<vmem>>, vector<1x32x32xf32>
    %3 = vector.shape_cast %2 : vector<1x32x32xf32> to vector<32x32xf32>
    %c1 = arith.constant 1 : index
    %c0_5 = arith.constant 0 : index
    %c0_6 = arith.constant 0 : index
    %4 = vector.load %arg2[%c1, %c0_5, %c0_6] : memref<2x32x32xf32, #tpu.memory_space<vmem>>, vector<1x32x32xf32>
    %5 = vector.shape_cast %4 : vector<1x32x32xf32> to vector<32x32xf32>
    %c0_7 = arith.constant 0 : index
    %c0_8 = arith.constant 0 : index
    %6 = vector.load %arg3[%c0_7, %c0_8] : memref<4x32xf32, #tpu.memory_space<vmem>>, vector<4x32xf32>
    %c0_9 = arith.constant 0 : index
    %c0_10 = arith.constant 0 : index
    %7 = vector.load %arg4[%c0_9, %c0_10] : memref<128x32xf32, #tpu.memory_space<vmem>>, vector<128x32xf32>
    %c0_11 = arith.constant 0 : index
    %c0_12 = arith.constant 0 : index
    %8 = vector.load %arg5[%c0_11, %c0_12] : memref<6x32xf32, #tpu.memory_space<vmem>>, vector<6x32xf32>
    %9 = vector.extract_strided_slice %8 {offsets = [0, 0], sizes = [1, 32], strides = [1, 1]} : vector<6x32xf32> to vector<1x32xf32>
    %10 = vector.extract_strided_slice %8 {offsets = [1, 0], sizes = [1, 32], strides = [1, 1]} : vector<6x32xf32> to vector<1x32xf32>
    %11 = vector.extract_strided_slice %8 {offsets = [2, 0], sizes = [1, 32], strides = [1, 1]} : vector<6x32xf32> to vector<1x32xf32>
    %12 = vector.extract_strided_slice %8 {offsets = [3, 0], sizes = [1, 32], strides = [1, 1]} : vector<6x32xf32> to vector<1x32xf32>
    %13 = vector.extract_strided_slice %8 {offsets = [4, 0], sizes = [1, 32], strides = [1, 1]} : vector<6x32xf32> to vector<1x32xf32>
    %14 = vector.extract_strided_slice %8 {offsets = [5, 0], sizes = [1, 32], strides = [1, 1]} : vector<6x32xf32> to vector<1x32xf32>
    %15 = vector.extract_strided_slice %7 {offsets = [0, 0], sizes = [32, 32], strides = [1, 1]} : vector<128x32xf32> to vector<32x32xf32>
    %16 = vector.extract_strided_slice %7 {offsets = [32, 0], sizes = [32, 32], strides = [1, 1]} : vector<128x32xf32> to vector<32x32xf32>
    %17 = vector.extract_strided_slice %7 {offsets = [64, 0], sizes = [32, 32], strides = [1, 1]} : vector<128x32xf32> to vector<32x32xf32>
    %18 = vector.extract_strided_slice %7 {offsets = [96, 0], sizes = [32, 32], strides = [1, 1]} : vector<128x32xf32> to vector<32x32xf32>
    %cst = arith.constant dense<0.000000e+00> : vector<32xf32>
    %19 = vector.multi_reduction <add>, %1, %cst [1] : vector<32x32xf32> to vector<32xf32>
    %20 = vector.shape_cast %19 : vector<32xf32> to vector<32x1xf32>
    %cst_13 = arith.constant 3.200000e+01 : f32
    %21 = vector.broadcast %cst_13 : f32 to vector<32x1xf32>
    %22 = arith.divf %20, %21 : vector<32x1xf32>
    %23 = vector.broadcast %22 : vector<32x1xf32> to vector<32x32xf32>
    %24 = arith.subf %1, %23 : vector<32x32xf32>
    %25 = arith.mulf %24, %24 : vector<32x32xf32>
    %cst_14 = arith.constant dense<0.000000e+00> : vector<32xf32>
    %26 = vector.multi_reduction <add>, %25, %cst_14 [1] : vector<32x32xf32> to vector<32xf32>
    %27 = vector.shape_cast %26 : vector<32xf32> to vector<32x1xf32>
    %cst_15 = arith.constant 3.200000e+01 : f32
    %28 = vector.broadcast %cst_15 : f32 to vector<32x1xf32>
    %29 = arith.divf %27, %28 : vector<32x1xf32>
    %30 = vector.broadcast %22 : vector<32x1xf32> to vector<32x32xf32>
    %31 = arith.subf %1, %30 : vector<32x32xf32>
    %cst_16 = arith.constant 9.99999997E-7 : f32
    %32 = vector.broadcast %cst_16 : f32 to vector<32x1xf32>
    %33 = arith.addf %29, %32 : vector<32x1xf32>
    %34 = math.rsqrt %33 : vector<32x1xf32>
    %35 = vector.broadcast %34 : vector<32x1xf32> to vector<32x32xf32>
    %36 = arith.mulf %31, %35 : vector<32x32xf32>
    %37 = vector.broadcast %9 : vector<1x32xf32> to vector<32x32xf32>
    %38 = arith.mulf %36, %37 : vector<32x32xf32>
    %39 = vector.broadcast %10 : vector<1x32xf32> to vector<32x32xf32>
    %40 = arith.addf %38, %39 : vector<32x32xf32>
    %cst_17 = arith.constant dense<0.000000e+00> : vector<32x32xf32>
    %41 = tpu.matmul %40, %15, %cst_17 {dimension_numbers = #tpu.dot_dimension_numbers<[1], [0], [0], [1], [0, 0, 1, 1], [], []>} : vector<32x32xf32>, vector<32x32xf32>, vector<32x32xf32> -> vector<32x32xf32>
    %42 = vector.broadcast %11 : vector<1x32xf32> to vector<32x32xf32>
    %43 = arith.addf %41, %42 : vector<32x32xf32>
    %cst_18 = arith.constant dense<0.000000e+00> : vector<32x32xf32>
    %44 = tpu.matmul %40, %16, %cst_18 {dimension_numbers = #tpu.dot_dimension_numbers<[1], [0], [0], [1], [0, 0, 1, 1], [], []>} : vector<32x32xf32>, vector<32x32xf32>, vector<32x32xf32> -> vector<32x32xf32>
    %45 = vector.broadcast %12 : vector<1x32xf32> to vector<32x32xf32>
    %46 = arith.addf %44, %45 : vector<32x32xf32>
    %cst_19 = arith.constant dense<0.000000e+00> : vector<32x32xf32>
    %47 = tpu.matmul %40, %17, %cst_19 {dimension_numbers = #tpu.dot_dimension_numbers<[1], [0], [0], [1], [0, 0, 1, 1], [], []>} : vector<32x32xf32>, vector<32x32xf32>, vector<32x32xf32> -> vector<32x32xf32>
    %48 = vector.broadcast %13 : vector<1x32xf32> to vector<32x32xf32>
    %49 = arith.addf %47, %48 : vector<32x32xf32>
    %cst_20 = arith.constant 0.000000e+00 : f32
    %50 = vector.broadcast %cst_20 : f32 to vector<32x32xf32>
    %51 = vector.extract_strided_slice %6 {offsets = [0, 0], sizes = [1, 32], strides = [1, 1]} : vector<4x32xf32> to vector<1x32xf32>
    %52 = vector.broadcast %51 : vector<1x32xf32> to vector<32x32xf32>
    %53 = arith.mulf %43, %52 : vector<32x32xf32>
    %cst_21 = arith.constant dense<0.000000e+00> : vector<32x32xf32>
    %54 = tpu.matmul %53, %46, %cst_21 {dimension_numbers = #tpu.dot_dimension_numbers<[1], [1], [0], [0], [0, 0, 1, 0], [], []>} : vector<32x32xf32>, vector<32x32xf32>, vector<32x32xf32> -> vector<32x32xf32>
    %cst_22 = arith.constant 0.353553385 : f32
    %55 = vector.broadcast %cst_22 : f32 to vector<32x32xf32>
    %56 = arith.mulf %54, %55 : vector<32x32xf32>
    %57 = arith.addf %56, %3 : vector<32x32xf32>
    %cst_23 = arith.constant dense<0xFF800000> : vector<32xf32>
    %58 = vector.multi_reduction <maximumf>, %57, %cst_23 [1] : vector<32x32xf32> to vector<32xf32>
    %59 = vector.shape_cast %58 : vector<32xf32> to vector<32x1xf32>
    %60 = vector.broadcast %59 : vector<32x1xf32> to vector<32x32xf32>
    %61 = arith.subf %57, %60 : vector<32x32xf32>
    %62 = math.exp %61 : vector<32x32xf32>
    %cst_24 = arith.constant dense<0.000000e+00> : vector<32xf32>
    %63 = vector.multi_reduction <add>, %62, %cst_24 [1] : vector<32x32xf32> to vector<32xf32>
    %64 = vector.shape_cast %63 : vector<32xf32> to vector<32x1xf32>
    %65 = vector.broadcast %64 : vector<32x1xf32> to vector<32x32xf32>
    %66 = arith.divf %62, %65 : vector<32x32xf32>
    %67 = vector.broadcast %51 : vector<1x32xf32> to vector<32x32xf32>
    %68 = arith.mulf %49, %67 : vector<32x32xf32>
    %cst_25 = arith.constant dense<0.000000e+00> : vector<32x32xf32>
    %69 = tpu.matmul %66, %68, %cst_25 {dimension_numbers = #tpu.dot_dimension_numbers<[1], [0], [0], [1], [0, 0, 1, 1], [], []>} : vector<32x32xf32>, vector<32x32xf32>, vector<32x32xf32> -> vector<32x32xf32>
    %70 = arith.addf %50, %69 : vector<32x32xf32>
    %71 = vector.extract_strided_slice %6 {offsets = [1, 0], sizes = [1, 32], strides = [1, 1]} : vector<4x32xf32> to vector<1x32xf32>
    %72 = vector.broadcast %71 : vector<1x32xf32> to vector<32x32xf32>
    %73 = arith.mulf %43, %72 : vector<32x32xf32>
    %cst_26 = arith.constant dense<0.000000e+00> : vector<32x32xf32>
    %74 = tpu.matmul %73, %46, %cst_26 {dimension_numbers = #tpu.dot_dimension_numbers<[1], [1], [0], [0], [0, 0, 1, 0], [], []>} : vector<32x32xf32>, vector<32x32xf32>, vector<32x32xf32> -> vector<32x32xf32>
    %cst_27 = arith.constant 0.353553385 : f32
    %75 = vector.broadcast %cst_27 : f32 to vector<32x32xf32>
    %76 = arith.mulf %74, %75 : vector<32x32xf32>
    %77 = arith.addf %76, %3 : vector<32x32xf32>
    %cst_28 = arith.constant dense<0xFF800000> : vector<32xf32>
    %78 = vector.multi_reduction <maximumf>, %77, %cst_28 [1] : vector<32x32xf32> to vector<32xf32>
    %79 = vector.shape_cast %78 : vector<32xf32> to vector<32x1xf32>
    %80 = vector.broadcast %79 : vector<32x1xf32> to vector<32x32xf32>
    %81 = arith.subf %77, %80 : vector<32x32xf32>
    %82 = math.exp %81 : vector<32x32xf32>
    %cst_29 = arith.constant dense<0.000000e+00> : vector<32xf32>
    %83 = vector.multi_reduction <add>, %82, %cst_29 [1] : vector<32x32xf32> to vector<32xf32>
    %84 = vector.shape_cast %83 : vector<32xf32> to vector<32x1xf32>
    %85 = vector.broadcast %84 : vector<32x1xf32> to vector<32x32xf32>
    %86 = arith.divf %82, %85 : vector<32x32xf32>
    %87 = vector.broadcast %71 : vector<1x32xf32> to vector<32x32xf32>
    %88 = arith.mulf %49, %87 : vector<32x32xf32>
    %cst_30 = arith.constant dense<0.000000e+00> : vector<32x32xf32>
    %89 = tpu.matmul %86, %88, %cst_30 {dimension_numbers = #tpu.dot_dimension_numbers<[1], [0], [0], [1], [0, 0, 1, 1], [], []>} : vector<32x32xf32>, vector<32x32xf32>, vector<32x32xf32> -> vector<32x32xf32>
    %90 = arith.addf %70, %89 : vector<32x32xf32>
    %91 = vector.extract_strided_slice %6 {offsets = [2, 0], sizes = [1, 32], strides = [1, 1]} : vector<4x32xf32> to vector<1x32xf32>
    %92 = vector.broadcast %91 : vector<1x32xf32> to vector<32x32xf32>
    %93 = arith.mulf %43, %92 : vector<32x32xf32>
    %cst_31 = arith.constant dense<0.000000e+00> : vector<32x32xf32>
    %94 = tpu.matmul %93, %46, %cst_31 {dimension_numbers = #tpu.dot_dimension_numbers<[1], [1], [0], [0], [0, 0, 1, 0], [], []>} : vector<32x32xf32>, vector<32x32xf32>, vector<32x32xf32> -> vector<32x32xf32>
    %cst_32 = arith.constant 0.353553385 : f32
    %95 = vector.broadcast %cst_32 : f32 to vector<32x32xf32>
    %96 = arith.mulf %94, %95 : vector<32x32xf32>
    %97 = arith.addf %96, %3 : vector<32x32xf32>
    %cst_33 = arith.constant dense<0xFF800000> : vector<32xf32>
    %98 = vector.multi_reduction <maximumf>, %97, %cst_33 [1] : vector<32x32xf32> to vector<32xf32>
    %99 = vector.shape_cast %98 : vector<32xf32> to vector<32x1xf32>
    %100 = vector.broadcast %99 : vector<32x1xf32> to vector<32x32xf32>
    %101 = arith.subf %97, %100 : vector<32x32xf32>
    %102 = math.exp %101 : vector<32x32xf32>
    %cst_34 = arith.constant dense<0.000000e+00> : vector<32xf32>
    %103 = vector.multi_reduction <add>, %102, %cst_34 [1] : vector<32x32xf32> to vector<32xf32>
    %104 = vector.shape_cast %103 : vector<32xf32> to vector<32x1xf32>
    %105 = vector.broadcast %104 : vector<32x1xf32> to vector<32x32xf32>
    %106 = arith.divf %102, %105 : vector<32x32xf32>
    %107 = vector.broadcast %91 : vector<1x32xf32> to vector<32x32xf32>
    %108 = arith.mulf %49, %107 : vector<32x32xf32>
    %cst_35 = arith.constant dense<0.000000e+00> : vector<32x32xf32>
    %109 = tpu.matmul %106, %108, %cst_35 {dimension_numbers = #tpu.dot_dimension_numbers<[1], [0], [0], [1], [0, 0, 1, 1], [], []>} : vector<32x32xf32>, vector<32x32xf32>, vector<32x32xf32> -> vector<32x32xf32>
    %110 = arith.addf %90, %109 : vector<32x32xf32>
    %111 = vector.extract_strided_slice %6 {offsets = [3, 0], sizes = [1, 32], strides = [1, 1]} : vector<4x32xf32> to vector<1x32xf32>
    %112 = vector.broadcast %111 : vector<1x32xf32> to vector<32x32xf32>
    %113 = arith.mulf %43, %112 : vector<32x32xf32>
    %cst_36 = arith.constant dense<0.000000e+00> : vector<32x32xf32>
    %114 = tpu.matmul %113, %46, %cst_36 {dimension_numbers = #tpu.dot_dimension_numbers<[1], [1], [0], [0], [0, 0, 1, 0], [], []>} : vector<32x32xf32>, vector<32x32xf32>, vector<32x32xf32> -> vector<32x32xf32>
    %cst_37 = arith.constant 0.353553385 : f32
    %115 = vector.broadcast %cst_37 : f32 to vector<32x32xf32>
    %116 = arith.mulf %114, %115 : vector<32x32xf32>
    %117 = arith.addf %116, %3 : vector<32x32xf32>
    %cst_38 = arith.constant dense<0xFF800000> : vector<32xf32>
    %118 = vector.multi_reduction <maximumf>, %117, %cst_38 [1] : vector<32x32xf32> to vector<32xf32>
    %119 = vector.shape_cast %118 : vector<32xf32> to vector<32x1xf32>
    %120 = vector.broadcast %119 : vector<32x1xf32> to vector<32x32xf32>
    %121 = arith.subf %117, %120 : vector<32x32xf32>
    %122 = math.exp %121 : vector<32x32xf32>
    %cst_39 = arith.constant dense<0.000000e+00> : vector<32xf32>
    %123 = vector.multi_reduction <add>, %122, %cst_39 [1] : vector<32x32xf32> to vector<32xf32>
    %124 = vector.shape_cast %123 : vector<32xf32> to vector<32x1xf32>
    %125 = vector.broadcast %124 : vector<32x1xf32> to vector<32x32xf32>
    %126 = arith.divf %122, %125 : vector<32x32xf32>
    %127 = vector.broadcast %111 : vector<1x32xf32> to vector<32x32xf32>
    %128 = arith.mulf %49, %127 : vector<32x32xf32>
    %cst_40 = arith.constant dense<0.000000e+00> : vector<32x32xf32>
    %129 = tpu.matmul %126, %128, %cst_40 {dimension_numbers = #tpu.dot_dimension_numbers<[1], [0], [0], [1], [0, 0, 1, 1], [], []>} : vector<32x32xf32>, vector<32x32xf32>, vector<32x32xf32> -> vector<32x32xf32>
    %130 = arith.addf %110, %129 : vector<32x32xf32>
    %cst_41 = arith.constant dense<0.000000e+00> : vector<32x32xf32>
    %131 = tpu.matmul %130, %18, %cst_41 {dimension_numbers = #tpu.dot_dimension_numbers<[1], [0], [0], [1], [0, 0, 1, 1], [], []>} : vector<32x32xf32>, vector<32x32xf32>, vector<32x32xf32> -> vector<32x32xf32>
    %132 = vector.broadcast %14 : vector<1x32xf32> to vector<32x32xf32>
    %133 = arith.addf %131, %132 : vector<32x32xf32>
    %134 = arith.addf %133, %1 : vector<32x32xf32>
    %c0_42 = arith.constant 0 : index
    %c0_43 = arith.constant 0 : index
    %135 = vector.load %arg6[%c0_42, %c0_43] : memref<128x32xf32, #tpu.memory_space<vmem>>, vector<128x32xf32>
    %c0_44 = arith.constant 0 : index
    %c0_45 = arith.constant 0 : index
    %136 = vector.load %arg7[%c0_44, %c0_45] : memref<6x32xf32, #tpu.memory_space<vmem>>, vector<6x32xf32>
    %137 = vector.extract_strided_slice %136 {offsets = [0, 0], sizes = [1, 32], strides = [1, 1]} : vector<6x32xf32> to vector<1x32xf32>
    %138 = vector.extract_strided_slice %136 {offsets = [1, 0], sizes = [1, 32], strides = [1, 1]} : vector<6x32xf32> to vector<1x32xf32>
    %139 = vector.extract_strided_slice %136 {offsets = [2, 0], sizes = [1, 32], strides = [1, 1]} : vector<6x32xf32> to vector<1x32xf32>
    %140 = vector.extract_strided_slice %136 {offsets = [3, 0], sizes = [1, 32], strides = [1, 1]} : vector<6x32xf32> to vector<1x32xf32>
    %141 = vector.extract_strided_slice %136 {offsets = [4, 0], sizes = [1, 32], strides = [1, 1]} : vector<6x32xf32> to vector<1x32xf32>
    %142 = vector.extract_strided_slice %136 {offsets = [5, 0], sizes = [1, 32], strides = [1, 1]} : vector<6x32xf32> to vector<1x32xf32>
    %143 = vector.extract_strided_slice %135 {offsets = [0, 0], sizes = [32, 32], strides = [1, 1]} : vector<128x32xf32> to vector<32x32xf32>
    %144 = vector.extract_strided_slice %135 {offsets = [32, 0], sizes = [32, 32], strides = [1, 1]} : vector<128x32xf32> to vector<32x32xf32>
    %145 = vector.extract_strided_slice %135 {offsets = [64, 0], sizes = [32, 32], strides = [1, 1]} : vector<128x32xf32> to vector<32x32xf32>
    %146 = vector.extract_strided_slice %135 {offsets = [96, 0], sizes = [32, 32], strides = [1, 1]} : vector<128x32xf32> to vector<32x32xf32>
    %cst_46 = arith.constant dense<0.000000e+00> : vector<32xf32>
    %147 = vector.multi_reduction <add>, %134, %cst_46 [1] : vector<32x32xf32> to vector<32xf32>
    %148 = vector.shape_cast %147 : vector<32xf32> to vector<32x1xf32>
    %cst_47 = arith.constant 3.200000e+01 : f32
    %149 = vector.broadcast %cst_47 : f32 to vector<32x1xf32>
    %150 = arith.divf %148, %149 : vector<32x1xf32>
    %151 = vector.broadcast %150 : vector<32x1xf32> to vector<32x32xf32>
    %152 = arith.subf %134, %151 : vector<32x32xf32>
    %153 = arith.mulf %152, %152 : vector<32x32xf32>
    %cst_48 = arith.constant dense<0.000000e+00> : vector<32xf32>
    %154 = vector.multi_reduction <add>, %153, %cst_48 [1] : vector<32x32xf32> to vector<32xf32>
    %155 = vector.shape_cast %154 : vector<32xf32> to vector<32x1xf32>
    %cst_49 = arith.constant 3.200000e+01 : f32
    %156 = vector.broadcast %cst_49 : f32 to vector<32x1xf32>
    %157 = arith.divf %155, %156 : vector<32x1xf32>
    %158 = vector.broadcast %150 : vector<32x1xf32> to vector<32x32xf32>
    %159 = arith.subf %134, %158 : vector<32x32xf32>
    %cst_50 = arith.constant 9.99999997E-7 : f32
    %160 = vector.broadcast %cst_50 : f32 to vector<32x1xf32>
    %161 = arith.addf %157, %160 : vector<32x1xf32>
    %162 = math.rsqrt %161 : vector<32x1xf32>
    %163 = vector.broadcast %162 : vector<32x1xf32> to vector<32x32xf32>
    %164 = arith.mulf %159, %163 : vector<32x32xf32>
    %165 = vector.broadcast %137 : vector<1x32xf32> to vector<32x32xf32>
    %166 = arith.mulf %164, %165 : vector<32x32xf32>
    %167 = vector.broadcast %138 : vector<1x32xf32> to vector<32x32xf32>
    %168 = arith.addf %166, %167 : vector<32x32xf32>
    %cst_51 = arith.constant dense<0.000000e+00> : vector<32x32xf32>
    %169 = tpu.matmul %168, %143, %cst_51 {dimension_numbers = #tpu.dot_dimension_numbers<[1], [0], [0], [1], [0, 0, 1, 1], [], []>} : vector<32x32xf32>, vector<32x32xf32>, vector<32x32xf32> -> vector<32x32xf32>
    %170 = vector.broadcast %139 : vector<1x32xf32> to vector<32x32xf32>
    %171 = arith.addf %169, %170 : vector<32x32xf32>
    %cst_52 = arith.constant dense<0.000000e+00> : vector<32x32xf32>
    %172 = tpu.matmul %168, %144, %cst_52 {dimension_numbers = #tpu.dot_dimension_numbers<[1], [0], [0], [1], [0, 0, 1, 1], [], []>} : vector<32x32xf32>, vector<32x32xf32>, vector<32x32xf32> -> vector<32x32xf32>
    %173 = vector.broadcast %140 : vector<1x32xf32> to vector<32x32xf32>
    %174 = arith.addf %172, %173 : vector<32x32xf32>
    %cst_53 = arith.constant dense<0.000000e+00> : vector<32x32xf32>
    %175 = tpu.matmul %168, %145, %cst_53 {dimension_numbers = #tpu.dot_dimension_numbers<[1], [0], [0], [1], [0, 0, 1, 1], [], []>} : vector<32x32xf32>, vector<32x32xf32>, vector<32x32xf32> -> vector<32x32xf32>
    %176 = vector.broadcast %141 : vector<1x32xf32> to vector<32x32xf32>
    %177 = arith.addf %175, %176 : vector<32x32xf32>
    %cst_54 = arith.constant 0.000000e+00 : f32
    %178 = vector.broadcast %cst_54 : f32 to vector<32x32xf32>
    %179 = vector.extract_strided_slice %6 {offsets = [0, 0], sizes = [1, 32], strides = [1, 1]} : vector<4x32xf32> to vector<1x32xf32>
    %180 = vector.broadcast %179 : vector<1x32xf32> to vector<32x32xf32>
    %181 = arith.mulf %171, %180 : vector<32x32xf32>
    %cst_55 = arith.constant dense<0.000000e+00> : vector<32x32xf32>
    %182 = tpu.matmul %181, %174, %cst_55 {dimension_numbers = #tpu.dot_dimension_numbers<[1], [1], [0], [0], [0, 0, 1, 0], [], []>} : vector<32x32xf32>, vector<32x32xf32>, vector<32x32xf32> -> vector<32x32xf32>
    %cst_56 = arith.constant 0.353553385 : f32
    %183 = vector.broadcast %cst_56 : f32 to vector<32x32xf32>
    %184 = arith.mulf %182, %183 : vector<32x32xf32>
    %185 = arith.addf %184, %5 : vector<32x32xf32>
    %cst_57 = arith.constant dense<0xFF800000> : vector<32xf32>
    %186 = vector.multi_reduction <maximumf>, %185, %cst_57 [1] : vector<32x32xf32> to vector<32xf32>
    %187 = vector.shape_cast %186 : vector<32xf32> to vector<32x1xf32>
    %188 = vector.broadcast %187 : vector<32x1xf32> to vector<32x32xf32>
    %189 = arith.subf %185, %188 : vector<32x32xf32>
    %190 = math.exp %189 : vector<32x32xf32>
    %cst_58 = arith.constant dense<0.000000e+00> : vector<32xf32>
    %191 = vector.multi_reduction <add>, %190, %cst_58 [1] : vector<32x32xf32> to vector<32xf32>
    %192 = vector.shape_cast %191 : vector<32xf32> to vector<32x1xf32>
    %193 = vector.broadcast %192 : vector<32x1xf32> to vector<32x32xf32>
    %194 = arith.divf %190, %193 : vector<32x32xf32>
    %195 = vector.broadcast %179 : vector<1x32xf32> to vector<32x32xf32>
    %196 = arith.mulf %177, %195 : vector<32x32xf32>
    %cst_59 = arith.constant dense<0.000000e+00> : vector<32x32xf32>
    %197 = tpu.matmul %194, %196, %cst_59 {dimension_numbers = #tpu.dot_dimension_numbers<[1], [0], [0], [1], [0, 0, 1, 1], [], []>} : vector<32x32xf32>, vector<32x32xf32>, vector<32x32xf32> -> vector<32x32xf32>
    %198 = arith.addf %178, %197 : vector<32x32xf32>
    %199 = vector.extract_strided_slice %6 {offsets = [1, 0], sizes = [1, 32], strides = [1, 1]} : vector<4x32xf32> to vector<1x32xf32>
    %200 = vector.broadcast %199 : vector<1x32xf32> to vector<32x32xf32>
    %201 = arith.mulf %171, %200 : vector<32x32xf32>
    %cst_60 = arith.constant dense<0.000000e+00> : vector<32x32xf32>
    %202 = tpu.matmul %201, %174, %cst_60 {dimension_numbers = #tpu.dot_dimension_numbers<[1], [1], [0], [0], [0, 0, 1, 0], [], []>} : vector<32x32xf32>, vector<32x32xf32>, vector<32x32xf32> -> vector<32x32xf32>
    %cst_61 = arith.constant 0.353553385 : f32
    %203 = vector.broadcast %cst_61 : f32 to vector<32x32xf32>
    %204 = arith.mulf %202, %203 : vector<32x32xf32>
    %205 = arith.addf %204, %5 : vector<32x32xf32>
    %cst_62 = arith.constant dense<0xFF800000> : vector<32xf32>
    %206 = vector.multi_reduction <maximumf>, %205, %cst_62 [1] : vector<32x32xf32> to vector<32xf32>
    %207 = vector.shape_cast %206 : vector<32xf32> to vector<32x1xf32>
    %208 = vector.broadcast %207 : vector<32x1xf32> to vector<32x32xf32>
    %209 = arith.subf %205, %208 : vector<32x32xf32>
    %210 = math.exp %209 : vector<32x32xf32>
    %cst_63 = arith.constant dense<0.000000e+00> : vector<32xf32>
    %211 = vector.multi_reduction <add>, %210, %cst_63 [1] : vector<32x32xf32> to vector<32xf32>
    %212 = vector.shape_cast %211 : vector<32xf32> to vector<32x1xf32>
    %213 = vector.broadcast %212 : vector<32x1xf32> to vector<32x32xf32>
    %214 = arith.divf %210, %213 : vector<32x32xf32>
    %215 = vector.broadcast %199 : vector<1x32xf32> to vector<32x32xf32>
    %216 = arith.mulf %177, %215 : vector<32x32xf32>
    %cst_64 = arith.constant dense<0.000000e+00> : vector<32x32xf32>
    %217 = tpu.matmul %214, %216, %cst_64 {dimension_numbers = #tpu.dot_dimension_numbers<[1], [0], [0], [1], [0, 0, 1, 1], [], []>} : vector<32x32xf32>, vector<32x32xf32>, vector<32x32xf32> -> vector<32x32xf32>
    %218 = arith.addf %198, %217 : vector<32x32xf32>
    %219 = vector.extract_strided_slice %6 {offsets = [2, 0], sizes = [1, 32], strides = [1, 1]} : vector<4x32xf32> to vector<1x32xf32>
    %220 = vector.broadcast %219 : vector<1x32xf32> to vector<32x32xf32>
    %221 = arith.mulf %171, %220 : vector<32x32xf32>
    %cst_65 = arith.constant dense<0.000000e+00> : vector<32x32xf32>
    %222 = tpu.matmul %221, %174, %cst_65 {dimension_numbers = #tpu.dot_dimension_numbers<[1], [1], [0], [0], [0, 0, 1, 0], [], []>} : vector<32x32xf32>, vector<32x32xf32>, vector<32x32xf32> -> vector<32x32xf32>
    %cst_66 = arith.constant 0.353553385 : f32
    %223 = vector.broadcast %cst_66 : f32 to vector<32x32xf32>
    %224 = arith.mulf %222, %223 : vector<32x32xf32>
    %225 = arith.addf %224, %5 : vector<32x32xf32>
    %cst_67 = arith.constant dense<0xFF800000> : vector<32xf32>
    %226 = vector.multi_reduction <maximumf>, %225, %cst_67 [1] : vector<32x32xf32> to vector<32xf32>
    %227 = vector.shape_cast %226 : vector<32xf32> to vector<32x1xf32>
    %228 = vector.broadcast %227 : vector<32x1xf32> to vector<32x32xf32>
    %229 = arith.subf %225, %228 : vector<32x32xf32>
    %230 = math.exp %229 : vector<32x32xf32>
    %cst_68 = arith.constant dense<0.000000e+00> : vector<32xf32>
    %231 = vector.multi_reduction <add>, %230, %cst_68 [1] : vector<32x32xf32> to vector<32xf32>
    %232 = vector.shape_cast %231 : vector<32xf32> to vector<32x1xf32>
    %233 = vector.broadcast %232 : vector<32x1xf32> to vector<32x32xf32>
    %234 = arith.divf %230, %233 : vector<32x32xf32>
    %235 = vector.broadcast %219 : vector<1x32xf32> to vector<32x32xf32>
    %236 = arith.mulf %177, %235 : vector<32x32xf32>
    %cst_69 = arith.constant dense<0.000000e+00> : vector<32x32xf32>
    %237 = tpu.matmul %234, %236, %cst_69 {dimension_numbers = #tpu.dot_dimension_numbers<[1], [0], [0], [1], [0, 0, 1, 1], [], []>} : vector<32x32xf32>, vector<32x32xf32>, vector<32x32xf32> -> vector<32x32xf32>
    %238 = arith.addf %218, %237 : vector<32x32xf32>
    %239 = vector.extract_strided_slice %6 {offsets = [3, 0], sizes = [1, 32], strides = [1, 1]} : vector<4x32xf32> to vector<1x32xf32>
    %240 = vector.broadcast %239 : vector<1x32xf32> to vector<32x32xf32>
    %241 = arith.mulf %171, %240 : vector<32x32xf32>
    %cst_70 = arith.constant dense<0.000000e+00> : vector<32x32xf32>
    %242 = tpu.matmul %241, %174, %cst_70 {dimension_numbers = #tpu.dot_dimension_numbers<[1], [1], [0], [0], [0, 0, 1, 0], [], []>} : vector<32x32xf32>, vector<32x32xf32>, vector<32x32xf32> -> vector<32x32xf32>
    %cst_71 = arith.constant 0.353553385 : f32
    %243 = vector.broadcast %cst_71 : f32 to vector<32x32xf32>
    %244 = arith.mulf %242, %243 : vector<32x32xf32>
    %245 = arith.addf %244, %5 : vector<32x32xf32>
    %cst_72 = arith.constant dense<0xFF800000> : vector<32xf32>
    %246 = vector.multi_reduction <maximumf>, %245, %cst_72 [1] : vector<32x32xf32> to vector<32xf32>
    %247 = vector.shape_cast %246 : vector<32xf32> to vector<32x1xf32>
    %248 = vector.broadcast %247 : vector<32x1xf32> to vector<32x32xf32>
    %249 = arith.subf %245, %248 : vector<32x32xf32>
    %250 = math.exp %249 : vector<32x32xf32>
    %cst_73 = arith.constant dense<0.000000e+00> : vector<32xf32>
    %251 = vector.multi_reduction <add>, %250, %cst_73 [1] : vector<32x32xf32> to vector<32xf32>
    %252 = vector.shape_cast %251 : vector<32xf32> to vector<32x1xf32>
    %253 = vector.broadcast %252 : vector<32x1xf32> to vector<32x32xf32>
    %254 = arith.divf %250, %253 : vector<32x32xf32>
    %255 = vector.broadcast %239 : vector<1x32xf32> to vector<32x32xf32>
    %256 = arith.mulf %177, %255 : vector<32x32xf32>
    %cst_74 = arith.constant dense<0.000000e+00> : vector<32x32xf32>
    %257 = tpu.matmul %254, %256, %cst_74 {dimension_numbers = #tpu.dot_dimension_numbers<[1], [0], [0], [1], [0, 0, 1, 1], [], []>} : vector<32x32xf32>, vector<32x32xf32>, vector<32x32xf32> -> vector<32x32xf32>
    %258 = arith.addf %238, %257 : vector<32x32xf32>
    %cst_75 = arith.constant dense<0.000000e+00> : vector<32x32xf32>
    %259 = tpu.matmul %258, %146, %cst_75 {dimension_numbers = #tpu.dot_dimension_numbers<[1], [0], [0], [1], [0, 0, 1, 1], [], []>} : vector<32x32xf32>, vector<32x32xf32>, vector<32x32xf32> -> vector<32x32xf32>
    %260 = vector.broadcast %142 : vector<1x32xf32> to vector<32x32xf32>
    %261 = arith.addf %259, %260 : vector<32x32xf32>
    %262 = arith.addf %261, %134 : vector<32x32xf32>
    %c0_76 = arith.constant 0 : index
    %c0_77 = arith.constant 0 : index
    %263 = vector.load %arg11[%c0_76, %c0_77] : memref<3x32xf32, #tpu.memory_space<vmem>>, vector<3x32xf32>
    %264 = vector.extract_strided_slice %263 {offsets = [0, 0], sizes = [1, 32], strides = [1, 1]} : vector<3x32xf32> to vector<1x32xf32>
    %265 = vector.extract_strided_slice %263 {offsets = [1, 0], sizes = [1, 32], strides = [1, 1]} : vector<3x32xf32> to vector<1x32xf32>
    %266 = vector.extract_strided_slice %263 {offsets = [2, 0], sizes = [1, 32], strides = [1, 1]} : vector<3x32xf32> to vector<1x32xf32>
    %cst_78 = arith.constant dense<0.000000e+00> : vector<32xf32>
    %267 = vector.multi_reduction <add>, %262, %cst_78 [1] : vector<32x32xf32> to vector<32xf32>
    %268 = vector.shape_cast %267 : vector<32xf32> to vector<32x1xf32>
    %cst_79 = arith.constant 3.200000e+01 : f32
    %269 = vector.broadcast %cst_79 : f32 to vector<32x1xf32>
    %270 = arith.divf %268, %269 : vector<32x1xf32>
    %271 = vector.broadcast %270 : vector<32x1xf32> to vector<32x32xf32>
    %272 = arith.subf %262, %271 : vector<32x32xf32>
    %273 = arith.mulf %272, %272 : vector<32x32xf32>
    %cst_80 = arith.constant dense<0.000000e+00> : vector<32xf32>
    %274 = vector.multi_reduction <add>, %273, %cst_80 [1] : vector<32x32xf32> to vector<32xf32>
    %275 = vector.shape_cast %274 : vector<32xf32> to vector<32x1xf32>
    %cst_81 = arith.constant 3.200000e+01 : f32
    %276 = vector.broadcast %cst_81 : f32 to vector<32x1xf32>
    %277 = arith.divf %275, %276 : vector<32x1xf32>
    %278 = vector.broadcast %270 : vector<32x1xf32> to vector<32x32xf32>
    %279 = arith.subf %262, %278 : vector<32x32xf32>
    %cst_82 = arith.constant 9.99999997E-7 : f32
    %280 = vector.broadcast %cst_82 : f32 to vector<32x1xf32>
    %281 = arith.addf %277, %280 : vector<32x1xf32>
    %282 = math.rsqrt %281 : vector<32x1xf32>
    %283 = vector.broadcast %282 : vector<32x1xf32> to vector<32x32xf32>
    %284 = arith.mulf %279, %283 : vector<32x32xf32>
    %285 = vector.broadcast %264 : vector<1x32xf32> to vector<32x32xf32>
    %286 = arith.mulf %284, %285 : vector<32x32xf32>
    %287 = vector.broadcast %265 : vector<1x32xf32> to vector<32x32xf32>
    %288 = arith.addf %286, %287 : vector<32x32xf32>
    %c0_83 = arith.constant 0 : index
    %c0_84 = arith.constant 0 : index
    %289 = vector.load %arg8[%c0_83, %c0_84] : memref<32x64xf32, #tpu.memory_space<vmem>>, vector<32x64xf32>
    %cst_85 = arith.constant dense<0.000000e+00> : vector<32x64xf32>
    %290 = tpu.matmul %288, %289, %cst_85 {dimension_numbers = #tpu.dot_dimension_numbers<[1], [0], [0], [1], [0, 0, 1, 1], [], []>} : vector<32x32xf32>, vector<32x64xf32>, vector<32x64xf32> -> vector<32x64xf32>
    %c0_86 = arith.constant 0 : index
    %c0_87 = arith.constant 0 : index
    %291 = vector.load %arg9[%c0_86, %c0_87] : memref<1x64xf32, #tpu.memory_space<vmem>>, vector<1x64xf32>
    %292 = vector.broadcast %291 : vector<1x64xf32> to vector<32x64xf32>
    %293 = arith.addf %290, %292 : vector<32x64xf32>
    %cst_88 = arith.constant 5.000000e-01 : f32
    %294 = vector.broadcast %cst_88 : f32 to vector<32x64xf32>
    %295 = arith.mulf %294, %293 : vector<32x64xf32>
    %cst_89 = arith.constant 0.707106769 : f32
    %296 = vector.broadcast %cst_89 : f32 to vector<32x64xf32>
    %297 = arith.mulf %293, %296 : vector<32x64xf32>
    %298 = math.erf %297 : vector<32x64xf32>
    %cst_90 = arith.constant 1.000000e+00 : f32
    %299 = vector.broadcast %cst_90 : f32 to vector<32x64xf32>
    %300 = arith.addf %299, %298 : vector<32x64xf32>
    %301 = arith.mulf %295, %300 : vector<32x64xf32>
    %c0_91 = arith.constant 0 : index
    %c0_92 = arith.constant 0 : index
    %302 = vector.load %arg10[%c0_91, %c0_92] : memref<64x32xf32, #tpu.memory_space<vmem>>, vector<64x32xf32>
    %cst_93 = arith.constant dense<0.000000e+00> : vector<32x32xf32>
    %303 = tpu.matmul %301, %302, %cst_93 {dimension_numbers = #tpu.dot_dimension_numbers<[1], [0], [0], [1], [0, 0, 1, 1], [], []>} : vector<32x64xf32>, vector<64x32xf32>, vector<32x32xf32> -> vector<32x32xf32>
    %304 = vector.broadcast %266 : vector<1x32xf32> to vector<32x32xf32>
    %305 = arith.addf %303, %304 : vector<32x32xf32>
    %306 = arith.addf %305, %262 : vector<32x32xf32>
    %c0_94 = arith.constant 0 : index
    %c0_95 = arith.constant 0 : index
    %c0_96 = arith.constant 0 : index
    %307 = vector.load %arg12[%c0_94, %c0_95, %c0_96] : memref<1x32x32xf32, #tpu.memory_space<vmem>>, vector<1x32x32xf32>
    %308 = vector.shape_cast %307 : vector<1x32x32xf32> to vector<32x32xf32>
    %309 = vector.shape_cast %306 : vector<32x32xf32> to vector<1x32x32xf32>
    tpu.vector_store %arg12[%c0_94, %c0_95, %c0_96], %309 {strides = array<i32>} : memref<1x32x32xf32, #tpu.memory_space<vmem>>, vector<1x32x32xf32>,
    return
  }
  func.func @transform_0(%arg0: i32) -> (i32, i32, i32) {
    %c0_i32 = arith.constant 0 : i32
    %c0_i32_0 = arith.constant 0 : i32
    %c0_i32_1 = arith.constant 0 : i32
    return %arg0, %c0_i32, %c0_i32_0 : i32, i32, i32
  }
  func.func @transform_1(%arg0: i32) -> (i32, i32, i32) {
    %c0_i32 = arith.constant 0 : i32
    %c0_i32_0 = arith.constant 0 : i32
    %c0_i32_1 = arith.constant 0 : i32
    %c0_i32_2 = arith.constant 0 : i32
    return %c0_i32, %c0_i32_0, %c0_i32_1 : i32, i32, i32
  }
  func.func @transform_2(%arg0: i32) -> (i32, i32) {
    %c0_i32 = arith.constant 0 : i32
    %c0_i32_0 = arith.constant 0 : i32
    %c0_i32_1 = arith.constant 0 : i32
    return %c0_i32, %c0_i32_0 : i32, i32
  }
  func.func @transform_3(%arg0: i32) -> (i32, i32) {
    %c0_i32 = arith.constant 0 : i32
    %c0_i32_0 = arith.constant 0 : i32
    %c0_i32_1 = arith.constant 0 : i32
    return %c0_i32, %c0_i32_0 : i32, i32
  }
  func.func @transform_4(%arg0: i32) -> (i32, i32) {
    %c0_i32 = arith.constant 0 : i32
    %c0_i32_0 = arith.constant 0 : i32
    %c0_i32_1 = arith.constant 0 : i32
    return %c0_i32, %c0_i32_0 : i32, i32
  }
  func.func @transform_5(%arg0: i32) -> (i32, i32) {
    %c0_i32 = arith.constant 0 : i32
    %c0_i32_0 = arith.constant 0 : i32
    %c0_i32_1 = arith.constant 0 : i32
    return %c0_i32, %c0_i32_0 : i32, i32
  }
  func.func @transform_6(%arg0: i32) -> (i32, i32) {
    %c0_i32 = arith.constant 0 : i32
    %c0_i32_0 = arith.constant 0 : i32
    %c0_i32_1 = arith.constant 0 : i32
    return %c0_i32, %c0_i32_0 : i32, i32
  }
  func.func @transform_7(%arg0: i32) -> (i32, i32) {
    %c0_i32 = arith.constant 0 : i32
    %c0_i32_0 = arith.constant 0 : i32
    %c0_i32_1 = arith.constant 0 : i32
    return %c0_i32, %c0_i32_0 : i32, i32
  }
  func.func @transform_8(%arg0: i32) -> (i32, i32) {
    %c0_i32 = arith.constant 0 : i32
    %c0_i32_0 = arith.constant 0 : i32
    %c0_i32_1 = arith.constant 0 : i32
    return %c0_i32, %c0_i32_0 : i32, i32
  }
  func.func @transform_9(%arg0: i32) -> (i32, i32) {
    %c0_i32 = arith.constant 0 : i32
    %c0_i32_0 = arith.constant 0 : i32
    %c0_i32_1 = arith.constant 0 : i32
    return %c0_i32, %c0_i32_0 : i32, i32
  }
  func.func @transform_10(%arg0: i32) -> (i32, i32) {
    %c0_i32 = arith.constant 0 : i32
    %c0_i32_0 = arith.constant 0 : i32
    %c0_i32_1 = arith.constant 0 : i32
    return %c0_i32, %c0_i32_0 : i32, i32
  }
  func.func @transform_11(%arg0: i32) -> (i32, i32, i32) {
    %c0_i32 = arith.constant 0 : i32
    %c0_i32_0 = arith.constant 0 : i32
    %c0_i32_1 = arith.constant 0 : i32
    return %arg0, %c0_i32, %c0_i32_0 : i32, i32, i32
  }
}

</mosaic_0001>

<bundles_post_ra>
// kernel: block_forward.1
= control target key start
LH: loop header
LB: loop body
LE: loop exit
PB: predicated region body
PF: predicated region fallthrough
CT: control target
= control target key end

     0   :  { %s6335_s0 = inlined_call_operand.vmem [shape: f32[2,32,32], index: 0, kind: input, shape index: {}]   ;;  %s6336_s1 = inlined_call_operand.vmem [shape: f32[2,32,32], index: 1, kind: input, shape index: {}]   ;;  %s6337_s2 = inlined_call_operand.vmem [shape: f32[4,32], index: 2, kind: input, shape index: {}]   ;;  %s6338_s3 = inlined_call_operand.vmem [shape: f32[128,32], index: 3, kind: input, shape index: {}]   ;;  %s6339_s4 = inlined_call_operand.vmem [shape: f32[6,32], index: 4, kind: input, shape index: {}]   ;;  %s6340_s5 = inlined_call_operand.vmem [shape: f32[128,32], index: 5, kind: input, shape index: {}]   ;;  %s6341_s6 = inlined_call_operand.vmem [shape: f32[6,32], index: 6, kind: input, shape index: {}]   ;;  %s6342_s7 = inlined_call_operand.vmem [shape: f32[32,64], index: 7, kind: input, shape index: {}]   ;;  %s6343_s8 = inlined_call_operand.vmem [shape: f32[1,64], index: 8, kind: input, shape index: {}]   ;;  %s6344_s9 = inlined_call_operand.vmem [shape: f32[64,32], index: 9, kind: input, shape index: {}]   ;;  %s6345_s10 = inlined_call_operand.vmem [shape: f32[3,32], index: 10, kind: input, shape index: {}]   ;;  %s6346_s11 = inlined_call_operand.hbm [shape: f32[2,32,32], index: 11, kind: output, shape index: {}]  }
   0x1   :  { %6347 = sst [smem:[#allocation6_spill]] %s6335_s0 }
   0x2   :  { %16 = vsyncpa [#allocation3], 0 }
   0x3   :  { %18 = vsyncpa [#allocation3 + $0x1], 0  ;;  %s5161_s17 = smov 0   ;;  %s5163_s18 = smov 0  }
   0x4   :  { %s5165_s19 = smov 0   ;;  %s5167_s20 = smov 0  }
   0x5 LB: > { %s5182_s21 = sadd.s32 4294967295, %s5096_s20   ;;  %s3818_s22 = sadd.s32 4294967294, %s5096_s20   ;;  %s5096_s20 = sphi %s5167_s20, %s6358_s20   ;;  %s5092_s19 = sphi %s5165_s19, %s6357_s19   ;;  %s5088_s18 = sphi %s5163_s18, %s6356_s18   ;;  %s5084_s17 = sphi %s5161_s17, %s6355_s17  }
   0x6   : > { %s5186_s23 = sadd.s32 1, %s5096_s20   ;;  %s267_s24 = sadd.s32 1, %s5092_s19 }
   0x7   : > { %s264_s25 = ssub.s32 %s5096_s20, %s5186_s23  ;;  %p277_p0 = scmp.ne.s32.totalorder %s5092_s19, %s5088_s18 }
   0x8   : > { %p265_p1 = scmp.eq.s32.totalorder %s264_s25, 0  ;;  %p278_p2 = scmp.eq.s32.totalorder %s5182_s21, 1 }
   0x9   : > { %p283_p3 = scmp.ne.s32.totalorder %s5088_s18, %s5084_s17  ;;  %p284_p4 = scmp.eq.s32.totalorder %s3818_s22, 1 }
   0xa   : > { %s5197_s26 = scalar_select %p265_p1, %s5092_s19, %s267_s24  }
   0xb   : > { %p5199_p5 = por %p278_p2, %p277_p0  ;;  %p5203_p6 = por %p284_p4, %p283_p3 }
   0xc   : > { %6348 = sst [smem:[#allocation5_spill]] %s5197_s26  ;;  %p3821_p7 = scmp.ge.s32.totalorder %s5096_s20, 1 }
   0xd   : > { %p340_p8 = scmp.lt.s32.totalorder %s5096_s20, 3 }
   0xf   : > { %p341_p9 = pnand %p3821_p7, %p340_p8 }
  0x10   : > { %p380_p10 = scmp.lt.s32.totalorder (!%p341_p9), %s5182_s21, 1  ;;  %vm416_vm0 = vcmask (!%p341_p9), 261120   ;;  %s6351_s0 = sld [smem:[#allocation6_spill]] (!%p341_p9)  ;;  %v399_v28 = vld [vmem:[%s6338_s3] sm:$0xff] (!%p341_p9)  ;;  %v400_v29 = vld [vmem:[%s6338_s3 + $0x8] sm:$0xff] (!%p341_p9)  ;;  %v401_v33 = vld [vmem:[%s6338_s3 + $0x10] sm:$0xff] (!%p341_p9)  ;;  %v470_v45 = vlaneseq (!%p341_p9) }
  0x11   : > { %344 = sbr.rel (%p341_p9) target bundleno = 3903 (0xf3f), region = 64  ;;  %v403_v30 = vld [vmem:[%s6338_s3 + $0x20] sm:$0xff] (!%p341_p9)  ;;  %v4557_v31 = vpack.c.bf16 (!%p341_p9), %v400_v29, %v399_v28  ;;  %v404_v32 = vld [vmem:[%s6338_s3 + $0x28] sm:$0xff] (!%p341_p9)  ;;  %v402_v34 = vld [vmem:[%s6338_s3 + $0x18] sm:$0xff] (!%p341_p9)  ;;  %vm3636_vm2 = vcmask (!%p341_p9), 523264   ;;  %s377_s12 = sand.u32 (!%p341_p9), 1, %s5088_s18  }
  0x12   : > { %v4565_v35 = vpack.c.bf16 (!%p341_p9), %v404_v32, %v403_v30  ;;  %v4561_v36 = vpack.c.bf16 (!%p341_p9), %v402_v34, %v401_v33  ;;  %v405_v37 = vld [vmem:[%s6338_s3 + $0x30] sm:$0xff] (!%p341_p9)  ;;  %v406_v38 = vld [vmem:[%s6338_s3 + $0x38] sm:$0xff] (!%p341_p9)  ;;  %v407_v40 = vld [vmem:[%s6338_s3 + $0x40] sm:$0xff] (!%p341_p9)  ;;  %v5274_v51 = vshrl.u32 (!%p341_p9), %v470_v45, 7  ;;  %s3822_s13 = sshll.u32 (!%p341_p9), %s377_s12, 5  ;;  %s3972_s16 = sshll.u32 (!%p341_p9), %s5182_s21, 9 }
  0x13   : > { %4558 = vmatprep.subr.bf16.mxu0 (!%p341_p9), %v4557_v31  ;;  %v4569_v39 = vpack.c.bf16 (!%p341_p9), %v406_v38, %v405_v37  ;;  %v408_v41 = vld [vmem:[%s6338_s3 + $0x48] sm:$0xff] (!%p341_p9)  ;;  %v5282_v58 = vld [vmem:[%s6339_s4] sm:$0x3f] (!%p341_p9)  ;;  %vm5340_vm1 = vmpackc.low (!%p341_p9), %vm416_vm0, %vm416_vm0  ;;  %s6287_s25 = scalar_lea.hbm (!%p341_p9), %s6346_s11, %s3972_s16  ;;  %s5098_s26 = smov (!%p341_p9), [#allocation2]  }
  0x14   : > { %4566 = vmatprep.subr.bf16.mxu1 (!%p341_p9), %v4565_v35  ;;  %4560 = vmatpush3.bf16.msra.mxu0 (!%p341_p9), %v4557_v31  ;;  %v4573_v42 = vpack.c.bf16 (!%p341_p9), %v408_v41, %v407_v40  ;;  %v5277_v56 = vsub.s32 (!%p341_p9), 0, %v5274_v51  ;;  %v5285_v59 = vsub.s32 (!%p341_p9), 1, %v5274_v51  ;;  %v678_v31 = vsub.s32 (!%p341_p9), 4, %v5274_v51 }
  0x15   : > { %4568 = vmatpush3.bf16.msra.mxu1 (!%p341_p9), %v4565_v35  ;;  %4562 = vmatprep.subr.bf16.mxu0 (!%p341_p9), %v4561_v36 }
  0x16   : > { %4570 = vmatprep.subr.bf16.mxu1 (!%p341_p9), %v4569_v39  ;;  %v473_v60 = vrot.slane (!%p341_p9), %v5282_v58, %v5277_v56  ;;  %v481_v63 = vrot.slane (!%p341_p9), %v5282_v58, %v5285_v59 }
  0x18   : > { %s381_s29 = scalar_select %p380_p10, %s5182_s21, 1  ;;  %4564 = vmatpush3.bf16.msra.mxu0 %v4561_v36 }
  0x19   : > { %4572 = vmatpush3.bf16.msra.mxu1 %v4569_v39  ;;  %4574 = vmatprep.subr.bf16.mxu0 %v4573_v42  ;;  %s6294_s21 = scalar_lea.sflag [#allocation3], %s377_s12 }
  0x1a   : > { %s3971_s30 = sshll.u32 %s381_s29, 5  ;;  %s5038_s29 = sshll.u32 %s5098_s26, 4  ;;  %s5039_s29 = int_to_ptr.vmem [resolvable:$false] %s5038_s29 }
  0x1b   : > { %s5214_s14 = scalar_lea.vmem %s6351_s0, %s3971_s30  ;;  %s5040_s30 = scalar_lea.vmem %s5039_s29, 1024 }
  0x1c   : > { %v385_v0 = vld [vmem:[%s5214_s14] sm:$0xff]  ;;  %v387_v1 = vld [vmem:[%s5214_s14 + $0x10] sm:$0xff]  ;;  %v386_v2 = vld [vmem:[%s5214_s14 + $0x8] sm:$0xff] }
  0x1d   : > { %v417_v3 = vsel %vm416_vm0, %v385_v0, 0.0  ;;  %v423_v4 = vsel %vm416_vm0, %v387_v1, 0.0  ;;  %v388_v5 = vld [vmem:[%s5214_s14 + $0x18] sm:$0xff]  ;;  %v420_v6 = vsel %vm416_vm0, %v386_v2, 0.0 }
  0x1e   : > { %418 = vadd.xlane.f32.xlu0 %v417_v3  ;;  %424 = vadd.xlane.f32.xlu1 %v423_v4  ;;  %v426_v7 = vsel %vm416_vm0, %v388_v5, 0.0 }
  0x22   : > { %421 = vadd.xlane.f32.xlu0 %v420_v6  ;;  %427 = vadd.xlane.f32.xlu1 %v426_v7  ;;  %v409_v7 = vld [vmem:[%s6338_s3 + $0x50] sm:$0xff] }
  0xab   : > { %v419_v8 = vpop.xlane.xlu0 %418  ;;  %v425_v9 = vpop.xlane.xlu1 %424 }
  0xac   : > { %v430_v10 = vmul.f32 0.03125, %v419_v8  ;;  %v432_v11 = vmul.f32 0.03125, %v425_v9  ;;  %v410_v8 = vld [vmem:[%s6338_s3 + $0x58] sm:$0xff] }
  0xae   : > { %v5224_v12 = vsub.f32 %v385_v0, %v430_v10  ;;  %v5226_v13 = vsub.f32 %v387_v1, %v432_v11 }
  0xaf   : > { %v422_v14 = vpop.xlane.xlu0 %421  ;;  %v428_v15 = vpop.xlane.xlu1 %427 }
  0xb0   : > { %v431_v16 = vmul.f32 0.03125, %v422_v14  ;;  %v433_v17 = vmul.f32 0.03125, %v428_v15  ;;  %v438_v18 = vmul.f32 %v5224_v12, %v5224_v12  ;;  %v440_v19 = vmul.f32 %v5226_v13, %v5226_v13 }
  0xb2   : > { %v5232_v20 = vsub.f32 %v386_v2, %v431_v16  ;;  %v5234_v21 = vsub.f32 %v388_v5, %v433_v17  ;;  %v442_v22 = vsel %vm416_vm0, %v438_v18, 0.0  ;;  %v448_v23 = vsel %vm416_vm0, %v440_v19, 0.0  ;;  %v398_v19 = vld [vmem:[%s6337_s2] sm:$0xf] }
  0xb3   : > { %443 = vadd.xlane.f32.xlu0 %v442_v22  ;;  %v5314_v17 = vsub.s32 3, %v5274_v51  ;;  %v5317_v18 = vsub.s32 2, %v5274_v51  ;;  %v5329_v22 = vrot.slane %v398_v19, %v5277_v56 }
  0xb4   : > { %v439_v24 = vmul.f32 %v5232_v20, %v5232_v20  ;;  %v441_v25 = vmul.f32 %v5234_v21, %v5234_v21 }
  0xb5   : > { %v5370_v45 = vrot.slane %v398_v19, %v5317_v18 }
  0xb6   : > { %v445_v26 = vsel %vm416_vm0, %v439_v24, 0.0  ;;  %v451_v27 = vsel %vm416_vm0, %v441_v25, 0.0 }
  0xb7   : > { %449 = vadd.xlane.f32.xlu0 %v448_v23  ;;  %446 = vadd.xlane.f32.xlu1 %v445_v26  ;;  %v5332_v23 = vrot.slane %v398_v19, %v5285_v59 }
  0xbb   : > { %452 = vadd.xlane.f32.xlu1 %v451_v27 }
 0x140   : > { %v444_v43 = vpop.xlane.xlu0 %443 }
 0x141   : > { %v454_v44 = vmul.f32 0.03125, %v444_v43 }
 0x143   : > { %v458_v46 = vadd.f32 1e-06, %v454_v44 }
 0x144   : > { %v447_v47 = vpop.xlane.xlu1 %446  ;;  %v450_v48 = vpop.xlane.xlu0 %449 }
 0x145   : > { %4870 = vrsqrt.f32 %v458_v46  ;;  %v455_v49 = vmul.f32 0.03125, %v447_v47  ;;  %v456_v50 = vmul.f32 0.03125, %v450_v48 }
 0x147   : > { %v459_v52 = vadd.f32 1e-06, %v455_v49  ;;  %v460_v53 = vadd.f32 1e-06, %v456_v50  ;;  %v5379_v49 = vrot.slane %v398_v19, %v5314_v17 }
 0x148   : > { %v453_v54 = vpop.xlane.xlu1 %452 }
 0x149   : > { %4872 = vrsqrt.f32 %v459_v52  ;;  %v457_v55 = vmul.f32 0.03125, %v453_v54 }
 0x14a   : > { %4874 = vrsqrt.f32 %v460_v53 }
 0x14b   : > { %v461_v57 = vadd.f32 1e-06, %v457_v55 }
 0x14d   : > { %4876 = vrsqrt.f32 %v461_v57 }
 0x14f   : > { %v4871_v61 = vpop.eup %4870 }
 0x150   : > { %v466_v62 = vmul.f32 %v4871_v61, %v5224_v12 }
 0x152   : > { %v474_v0 = vmul.f32 %v473_v60, %v466_v62 }
 0x153   : > { %v4873_v1 = vpop.eup %4872 }
 0x154   : > { %v4875_v2 = vpop.eup %4874  ;;  %v482_v3 = vadd.f32 %v481_v63, %v474_v0  ;;  %v467_v4 = vmul.f32 %v4873_v1, %v5232_v20  ;;  %v590_v20 = vrot.slane %v5282_v58, %v5314_v17 }
 0x155   : > { %v468_v5 = vmul.f32 %v4875_v2, %v5226_v13  ;;  %v4577_v13 = vpack.c.bf16 %v410_v8, %v409_v7 }
 0x156   : > { %4193 = vmatprep.mubr.msk.f32.mxu0 %vm416_vm0, %v482_v3  ;;  %4207 = vmatprep.mubr.msk.f32.mxu1 %vm416_vm0, %v482_v3  ;;  %v475_v6 = vmul.f32 %v473_v60, %v467_v4 }
 0x157   : > { %v4877_v9 = vpop.eup %4876  ;;  %v476_v10 = vmul.f32 %v473_v60, %v468_v5 }
 0x158   : > { %v483_v11 = vadd.f32 %v481_v63, %v475_v6  ;;  %v469_v12 = vmul.f32 %v4877_v9, %v5234_v21  ;;  %v5326_v21 = vrot.slane %v5282_v58, %v5317_v18 }
 0x159   : > { %v484_v14 = vadd.f32 %v481_v63, %v476_v10 }
 0x15a   : > { %4194 = vmatmul.mubr.msk.f32.vlgmr.msra.gmra.mrb[0].mxu0 %vm416_vm0, %v483_v11  ;;  %4208 = vmatmul.mubr.msk.f32.vlgmr.msra.gmra.mrb[0].mxu1 %vm416_vm0, %v483_v11  ;;  %v477_v15 = vmul.f32 %v473_v60, %v469_v12 }
 0x15b   : > { %4196 = vmatprep.mubr.msk.f32.mxu0 %vm416_vm0, %v484_v14  ;;  %4210 = vmatprep.mubr.msk.f32.mxu1 %vm416_vm0, %v484_v14 }
 0x15c   : > { %4576 = vmatpush3.bf16.msra.mxu0 %v4573_v42  ;;  %v485_v16 = vadd.f32 %v481_v63, %v477_v15  ;;  %v679_v42 = vrot.slane %v5282_v58, %v678_v31 }
 0x15d   : > { %4578 = vmatprep.subr.bf16.mxu0 %v4577_v13 }
 0x15e   : > { %4197 = vmatmul.mubr.msk.f32.gmra.mrb[2].mxu0 %vm416_vm0, %v485_v16  ;;  %4211 = vmatmul.mubr.msk.f32.gmra.mrb[2].mxu1 %vm416_vm0, %v485_v16 }
 0x15f   : > { %4221 = vmatprep.mubr.msk.f32.mxu0 %vm416_vm0, %v482_v3 }
 0x160   : > { %4580 = vmatpush3.bf16.msra.mxu0 %v4577_v13 }
 0x163   : > { %4222 = vmatmul.mubr.msk.f32.vlgmr.msra.gmra.mrb[4].mxu0 %vm416_vm0, %v483_v11 }
 0x164   : > { %4224 = vmatprep.mubr.msk.f32.mxu0 %vm416_vm0, %v484_v14 }
 0x167   : > { %4225 = vmatmul.mubr.msk.f32.gmra.mrb[6].mxu0 %vm416_vm0, %v485_v16 }
 0x22d   : > { %v4195_v24 = vpop.f32.mrb[0].mxu0  ;;  %v4209_v25 = vpop.f32.mrb[0].mxu1 }
 0x22e   : > { %v663_v26 = vadd.f32 %v4209_v25, %v590_v20  ;;  %v568_v27 = vpop.f32.mrb[1].mxu0  ;;  %v657_v28 = vpop.f32.mrb[1].mxu1  ;;  %v574_v61 = vadd.f32 %v4195_v24, %v5326_v21 }
 0x22f   : > { %v5335_v29 = vadd.f32 %v568_v27, %v5326_v21  ;;  %v658_v30 = vadd.f32 %v657_v28, %v590_v20 }
 0x230   : > { %v770_v25 = vmul.f32 %v5329_v22, %v574_v61 }
 0x231   : > { %v5344_v33 = vpack.c.bf16 %v663_v26, %v658_v30  ;;  %v4198_v34 = vpop.f32.mrb[2].mxu0  ;;  %v4212_v35 = vpop.f32.mrb[2].mxu1  ;;  %v769_v36 = vmul.f32 %v5329_v22, %v5335_v29  ;;  %v942_v37 = vmul.f32 %v5332_v23, %v5335_v29  ;;  %v943_v26 = vmul.f32 %v5332_v23, %v574_v61 }
 0x232   : > { %v673_v38 = vadd.f32 %v4212_v35, %v590_v20  ;;  %v578_v39 = vpop.f32.mrb[3].mxu0  ;;  %v667_v40 = vpop.f32.mrb[3].mxu1  ;;  %v584_v27 = vadd.f32 %v4198_v34, %v5326_v21  ;;  %v1297_v34 = vmul.f32 %v5370_v45, %v5335_v29 }
 0x233   : > { %v668_v41 = vadd.f32 %v667_v40, %v590_v20  ;;  %4583 = vmatprep.subr.msk.bf16.mxu1 %vm5340_vm1, %v5344_v33  ;;  %4235 = vmatprep.mubr.msk.f32.mxu1 %vm416_vm0, %v769_v36  ;;  %v579_v12 = vadd.f32 %v578_v39, %v5326_v21  ;;  %v1298_v36 = vmul.f32 %v5370_v45, %v574_v61 }
 0x234   : > { %4595 = vmatprep.subr.msk.bf16.mxu0 %vm5340_vm1, %v5344_v33  ;;  %4249 = vmatprep.mubr.msk.f32.mxu0 %vm416_vm0, %v942_v37  ;;  %v772_v35 = vmul.f32 %v5329_v22, %v584_v27  ;;  %v945_v21 = vmul.f32 %v5332_v23, %v584_v27  ;;  %v1559_v39 = vmul.f32 %v5379_v49, %v5335_v29 }
 0x235   : > { %v5361_v43 = vpack.c.bf16 %v673_v38, %v668_v41  ;;  %4586 = vmatpush3.bf16.xpose.msk.msra.mxu1 %vm5340_vm1, %v5344_v33  ;;  %4598 = vmatpush3.bf16.xpose.msk.msra.mxu0 %vm5340_vm1, %v5344_v33  ;;  %v771_v28 = vmul.f32 %v5329_v22, %v579_v12  ;;  %v944_v30 = vmul.f32 %v5332_v23, %v579_v12 }
 0x236   : > { %v4223_v44 = vpop.f32.mrb[4].mxu0  ;;  %v1299_v37 = vmul.f32 %v5370_v45, %v579_v12  ;;  %v1300_v38 = vmul.f32 %v5370_v45, %v584_v27  ;;  %v1560_v40 = vmul.f32 %v5379_v49, %v574_v61  ;;  %v1562_v41 = vmul.f32 %v5379_v49, %v584_v27 }
 0x237   : > { %v752_v46 = vadd.f32 %v4223_v44, %v679_v42  ;;  %v746_v47 = vpop.f32.mrb[5].mxu0  ;;  %4589 = vmatprep.subr.msk.bf16.mxu1 %vm5340_vm1, %v5361_v43  ;;  %4601 = vmatprep.subr.msk.bf16.mxu0 %vm5340_vm1, %v5361_v43  ;;  %v5476_v44 = vld [vmem:[%s6336_s1 + $0x8] sm:$0xff] }
 0x238   : > { %v747_v48 = vadd.f32 %v746_v47, %v679_v42 }
 0x239   : > { %v1096_v50 = vmul.f32 %v5332_v23, %v752_v46  ;;  %v935_v52 = vmul.f32 %v5329_v22, %v752_v46  ;;  %v1451_v53 = vmul.f32 %v5370_v45, %v752_v46  ;;  %v1713_v1 = vmul.f32 %v5379_v49, %v752_v46 }
 0x23a   : > { %v4226_v54 = vpop.f32.mrb[6].mxu0  ;;  %v1095_v55 = vmul.f32 %v5332_v23, %v747_v48  ;;  %v934_v57 = vmul.f32 %v5329_v22, %v747_v48  ;;  %v1450_v60 = vmul.f32 %v5370_v45, %v747_v48  ;;  %v1712_v0 = vmul.f32 %v5379_v49, %v747_v48  ;;  %v5481_v48 = vld [vmem:[%s6336_s1] sm:$0xff] }
 0x23b   : > { %v762_v62 = vadd.f32 %v4226_v54, %v679_v42  ;;  %v756_v63 = vpop.f32.mrb[7].mxu0 }
 0x23c   : > { %v757_v2 = vadd.f32 %v756_v63, %v679_v42  ;;  %v4605_v3 = vpack.c.bf16 %v1096_v50, %v1095_v55  ;;  %v5390_v4 = vpack.c.bf16 %v935_v52, %v934_v57  ;;  %v5392_v5 = vpack.c.bf16 %v1451_v53, %v1450_v60  ;;  %v5492_v57 = vld [vmem:[%s6336_s1 + $0x18] sm:$0xff]  ;;  %v5497_v60 = vld [vmem:[%s6336_s1 + $0x10] sm:$0xff] }
 0x23d   : > { %4592 = vmatpush3.bf16.xpose.msk.msra.mxu1 %vm5340_vm1, %v5361_v43  ;;  %4604 = vmatpush3.bf16.xpose.msk.msra.mxu0 %vm5340_vm1, %v5361_v43  ;;  %v1098_v6 = vmul.f32 %v5332_v23, %v762_v62  ;;  %v937_v7 = vmul.f32 %v5329_v22, %v762_v62  ;;  %v1453_v8 = vmul.f32 %v5370_v45, %v762_v62 }
 0x23e   : > { %4606 = vmatprep.subr.bf16.mxu1 %v4605_v3  ;;  %4623 = vmatprep.subr.msk.bf16.mxu0 %vm5340_vm1, %v5344_v33  ;;  %v1097_v9 = vmul.f32 %v5332_v23, %v757_v2  ;;  %v936_v10 = vmul.f32 %v5329_v22, %v757_v2  ;;  %v1452_v11 = vmul.f32 %v5370_v45, %v757_v2 }
 0x23f   : > { %v5410_v14 = vpack.c.bf16 %v1713_v1, %v1712_v0  ;;  %v1714_v13 = vmul.f32 %v5379_v49, %v757_v2  ;;  %v1715_v15 = vmul.f32 %v5379_v49, %v762_v62 }
 0x240   : > { %v4609_v16 = vpack.c.bf16 %v1098_v6, %v1097_v9  ;;  %v5414_v19 = vpack.c.bf16 %v937_v7, %v936_v10  ;;  %v5416_v20 = vpack.c.bf16 %v1453_v8, %v1452_v11 }
 0x241   : > { %v5418_v24 = vpack.c.bf16 %v1715_v15, %v1714_v13 }
 0x244   : > { %4236 = vmatmul.mubr.msk.f32.vlgmr.msra.gmra.mrb[4].mxu1 %vm416_vm0, %v770_v25  ;;  %4250 = vmatmul.mubr.msk.f32.vlgmr.msra.gmra.mrb[8].mxu0 %vm416_vm0, %v943_v26 }
 0x245   : > { %4238 = vmatprep.mubr.msk.f32.mxu1 %vm416_vm0, %v771_v28  ;;  %4252 = vmatprep.mubr.msk.f32.mxu0 %vm416_vm0, %v944_v30 }
 0x246   : > { %4608 = vmatpush3.bf16.msra.mxu1 %v4605_v3  ;;  %4626 = vmatpush3.bf16.xpose.msk.msra.mxu0 %vm5340_vm1, %v5344_v33 }
 0x247   : > { %4610 = vmatprep.subr.bf16.mxu1 %v4609_v16  ;;  %4629 = vmatprep.subr.msk.bf16.mxu0 %vm5340_vm1, %v5361_v43 }
 0x248   : > { %4239 = vmatmul.mubr.msk.f32.gmra.mrb[6].mxu1 %vm416_vm0, %v772_v35  ;;  %4253 = vmatmul.mubr.msk.f32.gmra.mrb[10].mxu0 %vm416_vm0, %v945_v21 }
 0x249   : > { %4291 = vmatprep.mubr.msk.f32.mxu0 %vm416_vm0, %v1297_v34 }
 0x24a   : > { %4612 = vmatpush3.bf16.msra.mxu1 %v4609_v16 }
 0x24b   : > { %4614 = vmatprep.subr.bf16.mxu1 %v5390_v4 }
 0x24e   : > { %4632 = vmatpush3.bf16.xpose.msk.msra.mxu0 %vm5340_vm1, %v5361_v43 }
 0x24f   : > { %4643 = vmatprep.subr.msk.bf16.mxu0 %vm5340_vm1, %v5344_v33 }
 0x255   : > { %4292 = vmatmul.mubr.msk.f32.vlgmr.msra.gmra.mrb[12].mxu0 %vm416_vm0, %v1298_v36 }
 0x256   : > { %4294 = vmatprep.mubr.msk.f32.mxu0 %vm416_vm0, %v1299_v37  ;;  %4646 = vmatpush3.bf16.xpose.msk.msra.mxu0 %vm5340_vm1, %v5344_v33  ;;  %v1561_v33 = vmul.f32 %v5379_v49, %v579_v12 }
 0x257   : > { %4649 = vmatprep.subr.msk.bf16.mxu0 %vm5340_vm1, %v5361_v43 }
 0x259   : > { %4295 = vmatmul.mubr.msk.f32.gmra.mrb[14].mxu0 %vm416_vm0, %v1300_v38 }
 0x25a   : > { %4319 = vmatprep.mubr.msk.f32.mxu0 %vm416_vm0, %v1559_v39 }
 0x25e   : > { %4652 = vmatpush3.bf16.xpose.msk.msra.mxu0 %vm5340_vm1, %v5361_v43 }
 0x265   : > { %4320 = vmatmul.mubr.msk.f32.vlgmr.msra.gmra.mrb[16].mxu0 %vm416_vm0, %v1560_v40 }
 0x266   : > { %4322 = vmatprep.mubr.msk.f32.mxu0 %vm416_vm0, %v1561_v33 }
 0x269   : > { %4323 = vmatmul.mubr.msk.f32.gmra.mrb[18].mxu0 %vm416_vm0, %v1562_v41 }
 0x317   : > { %v4237_v29 = vpop.f32.mrb[4].mxu1  ;;  %v4251_v42 = vpop.f32.mrb[8].mxu0 }
 0x318   : > { %v1044_v43 = vmul.f32 0.35355338, %v4251_v42  ;;  %v863_v46 = vpop.f32.mrb[5].mxu1  ;;  %v1024_v47 = vpop.f32.mrb[9].mxu0  ;;  %v883_v61 = vmul.f32 0.35355338, %v4237_v29 }
 0x319   : > { %v1043_v50 = vmul.f32 0.35355338, %v1024_v47  ;;  %v882_v1 = vmul.f32 0.35355338, %v863_v46 }
 0x31a   : > { %v5484_v52 = vadd.f32 %v1044_v43, %v5476_v44  ;;  %v5512_v10 = vadd.f32 %v883_v61, %v5476_v44 }
 0x31b   : > { %v4240_v53 = vpop.f32.mrb[6].mxu1  ;;  %v4254_v54 = vpop.f32.mrb[10].mxu0  ;;  %v5487_v55 = vadd.f32 %v1043_v50, %v5481_v48  ;;  %v5517_v15 = vadd.f32 %v882_v1, %v5481_v48 }
 0x31c   : > { %v1046_v62 = vmul.f32 0.35355338, %v4254_v54  ;;  %v873_v63 = vpop.f32.mrb[7].mxu1  ;;  %v1034_v0 = vpop.f32.mrb[11].mxu0  ;;  %v1054_v3 = vsel %vm416_vm0, %v5484_v52, -inf  ;;  %v893_v16 = vsel %vm416_vm0, %v5512_v10, -inf }
 0x31d   : > { %v1045_v2 = vmul.f32 0.35355338, %v1034_v0  ;;  %v1051_v6 = vsel %vm416_vm0, %v5487_v55, -inf  ;;  %1055 = vmax.xlane.f32.xlu1 %v1054_v3  ;;  %v885_v11 = vmul.f32 0.35355338, %v4240_v53  ;;  %v890_v25 = vsel %vm416_vm0, %v5517_v15, -inf }
 0x31e   : > { %1052 = vmax.xlane.f32.xlu0 %v1051_v6  ;;  %v5504_v7 = vadd.f32 %v1046_v62, %v5492_v57  ;;  %v884_v12 = vmul.f32 0.35355338, %v873_v63 }
 0x31f   : > { %v5507_v8 = vadd.f32 %v1045_v2, %v5497_v60  ;;  %v5524_v26 = vadd.f32 %v885_v11, %v5492_v57 }
 0x320   : > { %v1060_v9 = vsel %vm416_vm0, %v5504_v7, -inf  ;;  %v5527_v27 = vadd.f32 %v884_v12, %v5497_v60 }
 0x321   : > { %v1057_v13 = vsel %vm416_vm0, %v5507_v8, -inf  ;;  %1061 = vmax.xlane.f32.xlu1 %v1060_v9  ;;  %v899_v21 = vsel %vm416_vm0, %v5524_v26, -inf }
 0x322   : > { %1058 = vmax.xlane.f32.xlu0 %v1057_v13  ;;  %v896_v34 = vsel %vm416_vm0, %v5527_v27, -inf }
 0x325   : > { %894 = vmax.xlane.f32.xlu1 %v893_v16 }
 0x326   : > { %891 = vmax.xlane.f32.xlu0 %v890_v25 }
 0x328   : > { %v4293_v28 = vpop.f32.mrb[12].mxu0 }
 0x329   : > { %v1399_v30 = vmul.f32 0.35355338, %v4293_v28  ;;  %v1379_v35 = vpop.f32.mrb[13].mxu0  ;;  %900 = vmax.xlane.f32.xlu1 %v899_v21 }
 0x32a   : > { %v1398_v36 = vmul.f32 0.35355338, %v1379_v35  ;;  %897 = vmax.xlane.f32.xlu0 %v896_v34 }
 0x32b   : > { %v5534_v37 = vadd.f32 %v1399_v30, %v5476_v44 }
 0x32c   : > { %v4296_v38 = vpop.f32.mrb[14].mxu0  ;;  %v5537_v39 = vadd.f32 %v1398_v36, %v5481_v48 }
 0x32d   : > { %v1401_v40 = vmul.f32 0.35355338, %v4296_v38  ;;  %v1389_v33 = vpop.f32.mrb[15].mxu0  ;;  %v1409_v41 = vsel %vm416_vm0, %v5534_v37, -inf }
 0x32e   : > { %v1400_v29 = vmul.f32 0.35355338, %v1389_v33  ;;  %1410 = vmax.xlane.f32.xlu1 %v1409_v41  ;;  %v1406_v42 = vsel %vm416_vm0, %v5537_v39, -inf }
 0x32f   : > { %1407 = vmax.xlane.f32.xlu0 %v1406_v42  ;;  %v5544_v43 = vadd.f32 %v1401_v40, %v5492_v57 }
 0x330   : > { %v5547_v46 = vadd.f32 %v1400_v29, %v5497_v60 }
 0x331   : > { %v1415_v47 = vsel %vm416_vm0, %v5544_v43, -inf }
 0x332   : > { %1416 = vmax.xlane.f32.xlu1 %v1415_v47  ;;  %v1412_v50 = vsel %vm416_vm0, %v5547_v46, -inf }
 0x333   : > { %1413 = vmax.xlane.f32.xlu0 %v1412_v50 }
 0x338   : > { %v4321_v53 = vpop.f32.mrb[16].mxu0 }
 0x339   : > { %v1661_v54 = vmul.f32 0.35355338, %v4321_v53  ;;  %v1641_v61 = vpop.f32.mrb[17].mxu0 }
 0x33a   : > { %v1660_v62 = vmul.f32 0.35355338, %v1641_v61 }
 0x33b   : > { %v5554_v63 = vadd.f32 %v1661_v54, %v5476_v44 }
 0x33c   : > { %v4324_v0 = vpop.f32.mrb[18].mxu0  ;;  %v5557_v1 = vadd.f32 %v1660_v62, %v5481_v48 }
 0x33d   : > { %v1663_v2 = vmul.f32 0.35355338, %v4324_v0  ;;  %v1651_v3 = vpop.f32.mrb[19].mxu0  ;;  %v1671_v6 = vsel %vm416_vm0, %v5554_v63, -inf }
 0x33e   : > { %v1662_v9 = vmul.f32 0.35355338, %v1651_v3  ;;  %1672 = vmax.xlane.f32.xlu1 %v1671_v6  ;;  %v1668_v11 = vsel %vm416_vm0, %v5557_v1, -inf }
 0x33f   : > { %1669 = vmax.xlane.f32.xlu0 %v1668_v11  ;;  %v5564_v12 = vadd.f32 %v1663_v2, %v5492_v57 }
 0x340   : > { %v5567_v44 = vadd.f32 %v1662_v9, %v5497_v60 }
 0x341   : > { %v1677_v48 = vsel %vm416_vm0, %v5564_v12, -inf }
 0x342   : > { %1678 = vmax.xlane.f32.xlu1 %v1677_v48  ;;  %v1674_v13 = vsel %vm416_vm0, %v5567_v44, -inf }
 0x343   : > { %1675 = vmax.xlane.f32.xlu0 %v1674_v13 }
 0x3aa   : > { %v1056_v16 = vpop.xlane.xlu1 %1055 }
 0x3ab   : > { %v1053_v25 = vpop.xlane.xlu0 %1052  ;;  %v1064_v28 = vsub.f32 %v5484_v52, %v1056_v16 }
 0x3ac   : > { %v1063_v30 = vsub.f32 %v5487_v55, %v1053_v25 }
 0x3ad   : > { %v1069_v35 = vmul.f32 1.442695, %v1064_v28 }
 0x3ae   : > { %v1067_v57 = vmul.f32 1.442695, %v1063_v30  ;;  %v1062_v21 = vpop.xlane.xlu1 %1061 }
 0x3af   : > { %v1059_v34 = vpop.xlane.xlu0 %1058  ;;  %4878 = vpow2.f32 %v1069_v35  ;;  %v1066_v60 = vsub.f32 %v5504_v7, %v1062_v21 }
 0x3b0   : > { %v1065_v36 = vsub.f32 %v5507_v8, %v1059_v34  ;;  %4880 = vpow2.f32 %v1067_v57 }
 0x3b1   : > { %v1073_v38 = vmul.f32 1.442695, %v1066_v60 }
 0x3b2   : > { %v1071_v40 = vmul.f32 1.442695, %v1065_v36  ;;  %v895_v33 = vpop.xlane.xlu1 %894 }
 0x3b3   : > { %v892_v41 = vpop.xlane.xlu0 %891  ;;  %4882 = vpow2.f32 %v1073_v38  ;;  %v903_v29 = vsub.f32 %v5512_v10, %v895_v33 }
 0x3b4   : > { %v902_v52 = vsub.f32 %v5517_v15, %v892_v41  ;;  %4884 = vpow2.f32 %v1071_v40 }
 0x3b5   : > { %v908_v55 = vmul.f32 1.442695, %v903_v29 }
 0x3b6   : > { %v906_v42 = vmul.f32 1.442695, %v902_v52  ;;  %v901_v47 = vpop.xlane.xlu1 %900 }
 0x3b7   : > { %v898_v50 = vpop.xlane.xlu0 %897  ;;  %4886 = vpow2.f32 %v908_v55  ;;  %v905_v7 = vsub.f32 %v5524_v26, %v901_v47 }
 0x3b8   : > { %v904_v8 = vsub.f32 %v5527_v27, %v898_v50  ;;  %4888 = vpow2.f32 %v906_v42 }
 0x3b9   : > { %v5581_v53 = vpop.eup %4878  ;;  %v912_v54 = vmul.f32 1.442695, %v905_v7 }
 0x3ba   : > { %v910_v61 = vmul.f32 1.442695, %v904_v8  ;;  %v5583_v62 = vpop.eup %4880  ;;  %v1078_v15 = vsel %vm416_vm0, %v5581_v53, 0.0 }
 0x3bb   : > { %v1411_v10 = vpop.xlane.xlu1 %1410  ;;  %4890 = vpow2.f32 %v912_v54  ;;  %1079 = vadd.xlane.f32.xlu1 %v1078_v15  ;;  %v1075_v26 = vsel %vm416_vm0, %v5583_v62, 0.0 }
 0x3bc   : > { %v1419_v0 = vsub.f32 %v5534_v37, %v1411_v10  ;;  %v1408_v2 = vpop.xlane.xlu0 %1407  ;;  %4892 = vpow2.f32 %v910_v61  ;;  %1076 = vadd.xlane.f32.xlu0 %v1075_v26 }
 0x3bd   : > { %v1418_v27 = vsub.f32 %v5537_v39, %v1408_v2  ;;  %v5591_v3 = vpop.eup %4882 }
 0x3be   : > { %v1424_v6 = vmul.f32 1.442695, %v1419_v0  ;;  %v5593_v9 = vpop.eup %4884  ;;  %v1084_v13 = vsel %vm416_vm0, %v5591_v3, 0.0 }
 0x3bf   : > { %v1422_v11 = vmul.f32 1.442695, %v1418_v27  ;;  %v1417_v48 = vpop.xlane.xlu1 %1416  ;;  %1085 = vadd.xlane.f32.xlu1 %v1084_v13  ;;  %v1081_v25 = vsel %vm416_vm0, %v5593_v9, 0.0 }
 0x3c0   : > { %4894 = vpow2.f32 %v1424_v6  ;;  %v1421_v37 = vsub.f32 %v5544_v43, %v1417_v48  ;;  %v1414_v16 = vpop.xlane.xlu0 %1413  ;;  %1082 = vadd.xlane.f32.xlu0 %v1081_v25 }
 0x3c1   : > { %4896 = vpow2.f32 %v1422_v11  ;;  %v1420_v39 = vsub.f32 %v5547_v46, %v1414_v16  ;;  %v5601_v28 = vpop.eup %4886 }
 0x3c2   : > { %v1428_v30 = vmul.f32 1.442695, %v1421_v37  ;;  %v5603_v35 = vpop.eup %4888  ;;  %v917_v21 = vsel %vm416_vm0, %v5601_v28, 0.0 }
 0x3c3   : > { %v1426_v57 = vmul.f32 1.442695, %v1420_v39  ;;  %918 = vadd.xlane.f32.xlu1 %v917_v21  ;;  %v914_v43 = vsel %vm416_vm0, %v5603_v35, 0.0 }
 0x3c4   : > { %4898 = vpow2.f32 %v1428_v30  ;;  %915 = vadd.xlane.f32.xlu0 %v914_v43 }
 0x3c5   : > { %4900 = vpow2.f32 %v1426_v57  ;;  %v5609_v34 = vpop.eup %4890 }
 0x3c6   : > { %v5611_v46 = vpop.eup %4892  ;;  %v923_v60 = vsel %vm416_vm0, %v5609_v34, 0.0 }
 0x3c7   : > { %924 = vadd.xlane.f32.xlu1 %v923_v60  ;;  %v920_v36 = vsel %vm416_vm0, %v5611_v46, 0.0 }
 0x3c8   : > { %921 = vadd.xlane.f32.xlu0 %v920_v36 }
 0x3ca   : > { %v5617_v38 = vpop.eup %4894 }
 0x3cb   : > { %v5619_v40 = vpop.eup %4896  ;;  %v1673_v33 = vpop.xlane.xlu1 %1672  ;;  %v1433_v41 = vsel %vm416_vm0, %v5617_v38, 0.0 }
 0x3cc   : > { %v1681_v29 = vsub.f32 %v5554_v63, %v1673_v33  ;;  %1434 = vadd.xlane.f32.xlu1 %v1433_v41  ;;  %v1670_v52 = vpop.xlane.xlu0 %1669  ;;  %v1430_v55 = vsel %vm416_vm0, %v5619_v40, 0.0 }
 0x3cd   : > { %v1680_v42 = vsub.f32 %v5557_v1, %v1670_v52  ;;  %1431 = vadd.xlane.f32.xlu0 %v1430_v55 }
 0x3ce   : > { %v5627_v47 = vpop.eup %4898  ;;  %v1686_v50 = vmul.f32 1.442695, %v1681_v29 }
 0x3cf   : > { %v5629_v7 = vpop.eup %4900  ;;  %v1684_v8 = vmul.f32 1.442695, %v1680_v42  ;;  %v1679_v54 = vpop.xlane.xlu1 %1678  ;;  %v1439_v61 = vsel %vm416_vm0, %v5627_v47, 0.0 }
 0x3d0   : > { %4902 = vpow2.f32 %v1686_v50  ;;  %v1683_v63 = vsub.f32 %v5564_v12, %v1679_v54  ;;  %1440 = vadd.xlane.f32.xlu1 %v1439_v61  ;;  %v1676_v10 = vpop.xlane.xlu0 %1675  ;;  %v1436_v15 = vsel %vm416_vm0, %v5629_v7, 0.0 }
 0x3d1   : > { %4904 = vpow2.f32 %v1684_v8  ;;  %v1682_v1 = vsub.f32 %v5567_v44, %v1676_v10  ;;  %1437 = vadd.xlane.f32.xlu0 %v1436_v15 }
 0x3d2   : > { %v1690_v0 = vmul.f32 1.442695, %v1683_v63 }
 0x3d3   : > { %v1688_v2 = vmul.f32 1.442695, %v1682_v1 }
 0x3d4   : > { %4906 = vpow2.f32 %v1690_v0 }
 0x3d5   : > { %4908 = vpow2.f32 %v1688_v2 }
 0x3da   : > { %v5637_v26 = vpop.eup %4902 }
 0x3db   : > { %v5639_v27 = vpop.eup %4904  ;;  %v1695_v12 = vsel %vm416_vm0, %v5637_v26, 0.0 }
 0x3dc   : > { %1696 = vadd.xlane.f32.xlu1 %v1695_v12  ;;  %v1692_v6 = vsel %vm416_vm0, %v5639_v27, 0.0 }
 0x3dd   : > { %1693 = vadd.xlane.f32.xlu0 %v1692_v6 }
 0x3de   : > { %v5645_v11 = vpop.eup %4906 }
 0x3df   : > { %v5647_v44 = vpop.eup %4908  ;;  %v1701_v48 = vsel %vm416_vm0, %v5645_v11, 0.0 }
 0x3e0   : > { %1702 = vadd.xlane.f32.xlu1 %v1701_v48  ;;  %v1698_v13 = vsel %vm416_vm0, %v5647_v44, 0.0 }
 0x3e1   : > { %1699 = vadd.xlane.f32.xlu0 %v1698_v13 }
 0x448   : > { %v1080_v37 = vpop.xlane.xlu1 %1079 }
 0x449   : > { %4910 = vrcp.f32 %v1080_v37  ;;  %v1077_v16 = vpop.xlane.xlu0 %1076 }
 0x44a   : > { %4912 = vrcp.f32 %v1077_v16 }
 0x44c   : > { %v1086_v25 = vpop.xlane.xlu1 %1085 }
 0x44d   : > { %4914 = vrcp.f32 %v1086_v25  ;;  %v1083_v39 = vpop.xlane.xlu0 %1082 }
 0x44e   : > { %4916 = vrcp.f32 %v1083_v39 }
 0x450   : > { %v919_v30 = vpop.xlane.xlu1 %918 }
 0x451   : > { %4918 = vrcp.f32 %v919_v30  ;;  %v916_v57 = vpop.xlane.xlu0 %915 }
 0x452   : > { %4920 = vrcp.f32 %v916_v57 }
 0x453   : > { %v4911_v21 = vpop.eup %4910 }
 0x454   : > { %v4913_v43 = vpop.eup %4912  ;;  %v925_v60 = vpop.xlane.xlu1 %924  ;;  %v1090_v41 = vmul.f32 %v4911_v21, %v5581_v53 }
 0x455   : > { %4922 = vrcp.f32 %v925_v60  ;;  %v922_v36 = vpop.xlane.xlu0 %921  ;;  %v1088_v33 = vmul.f32 %v4913_v43, %v5583_v62 }
 0x456   : > { %4924 = vrcp.f32 %v922_v36 }
 0x457   : > { %v4915_v29 = vpop.eup %4914  ;;  %4263 = vmatprep.mubr.msk.f32.mxu1 %vm416_vm0, %v1088_v33 }
 0x458   : > { %v4917_v52 = vpop.eup %4916  ;;  %4264 = vmatmul.mubr.msk.f32.vlgmr.msra.gmra.mrb[8].mxu1 %vm416_vm0, %v1090_v41  ;;  %v1094_v62 = vmul.f32 %v4915_v29, %v5591_v3  ;;  %v5030_v29 = vld [vmem:[%s5214_s14 + $0x8] sm:$0xff] }
 0x459   : > { %v1435_v55 = vpop.xlane.xlu1 %1434  ;;  %4616 = vmatpush3.bf16.msra.mxu1 %v5390_v4  ;;  %v1092_v50 = vmul.f32 %v4917_v52, %v5593_v9 }
 0x45a   : > { %4926 = vrcp.f32 %v1435_v55  ;;  %v1432_v42 = vpop.xlane.xlu0 %1431  ;;  %4618 = vmatprep.subr.bf16.mxu1 %v5414_v19  ;;  %v5031_v55 = vld [vmem:[%s5214_s14] sm:$0xff] }
 0x45b   : > { %4928 = vrcp.f32 %v1432_v42  ;;  %v4919_v53 = vpop.eup %4918  ;;  %4266 = vmatprep.mubr.msk.f32.mxu1 %vm416_vm0, %v1092_v50 }
 0x45c   : > { %v4921_v8 = vpop.eup %4920  ;;  %4267 = vmatmul.mubr.msk.f32.gmra.mrb[10].mxu1 %vm416_vm0, %v1094_v62  ;;  %v929_v9 = vmul.f32 %v4919_v53, %v5601_v28 }
 0x45d   : > { %v1441_v54 = vpop.xlane.xlu1 %1440  ;;  %4620 = vmatpush3.bf16.msra.mxu1 %v5414_v19  ;;  %v927_v4 = vmul.f32 %v4921_v8, %v5603_v35 }
 0x45e   : > { %4930 = vrcp.f32 %v1441_v54  ;;  %v1438_v61 = vpop.xlane.xlu0 %1437  ;;  %4634 = vmatprep.subr.bf16.mxu1 %v5392_v5 }
 0x45f   : > { %4932 = vrcp.f32 %v1438_v61  ;;  %v4923_v63 = vpop.eup %4922  ;;  %4277 = vmatprep.mubr.msk.f32.mxu1 %vm416_vm0, %v927_v4  ;;  %v5032_v61 = vld [vmem:[%s5214_s14 + $0x18] sm:$0xff] }
 0x460   : > { %v4925_v3 = vpop.eup %4924  ;;  %4278 = vmatmul.mubr.msk.f32.vlgmr.msra.gmra.mrb[8].mxu1 %vm416_vm0, %v929_v9  ;;  %v933_v19 = vmul.f32 %v4923_v63, %v5609_v34  ;;  %v411_v34 = vld [vmem:[%s6338_s3 + $0x60] sm:$0xff]  ;;  %v5033_v9 = vld [vmem:[%s5214_s14 + $0x10] sm:$0xff]  ;;  %s379_s14 = scalar_lea.vmem [#allocation2], %s3822_s13 }
 0x461   : > { %4636 = vmatpush3.bf16.msra.mxu1 %v5392_v5  ;;  %v931_v10 = vmul.f32 %v4925_v3, %v5611_v46  ;;  %v412_v46 = vld [vmem:[%s6338_s3 + $0x68] sm:$0xff]  ;;  %s3756_s15 = sshll.u32 %s379_s14, 4  ;;  %s6289_s15 = int_to_ptr.vmem [resolvable:$true] %s3756_s15 }
 0x462   : > { %4638 = vmatprep.subr.bf16.mxu1 %v5416_v20  ;;  %v4661_v12 = vpack.c.bf16 %v412_v46, %v411_v34  ;;  %s5034_s0 = scalar_lea.vmem %s6289_s15, 512  ;;  %p5041_p0 = scmp.lt.s32.totalorder %s6289_s15, %s5039_s29 }
 0x463   : > { %4280 = vmatprep.mubr.msk.f32.mxu1 %vm416_vm0, %v931_v10  ;;  %p5035_p11 = scmp.ne.s32.totalorder %s6289_s15, %s5034_s0  ;;  %p5042_p1 = scmp.lt.s32.totalorder %s5040_s30, %s5034_s0 }
 0x464   : > { %v4927_v35 = vpop.eup %4926  ;;  %4281 = vmatmul.mubr.msk.f32.gmra.mrb[10].mxu1 %vm416_vm0, %v933_v19 }
 0x465   : > { %v4929_v28 = vpop.eup %4928  ;;  %4640 = vmatpush3.bf16.msra.mxu1 %v5416_v20  ;;  %v1445_v1 = vmul.f32 %v4927_v35, %v5617_v38  ;;  %p5036_p12 = pnand %p5035_p11, %p5199_p5  ;;  %p5043_p2 = por %p5042_p1, %p5041_p0 }
 0x466   : > { %v1443_v15 = vmul.f32 %v4929_v28, %v5619_v40  ;;  %4654 = vmatprep.subr.bf16.mxu1 %v5410_v14 }
 0x467   : > { %p5037_p13 = pneg %p5036_p12 }
 0x468   : > { %v4931_v5 = vpop.eup %4930  ;;  %4305 = vmatprep.mubr.msk.f32.mxu1 %vm416_vm0, %v1443_v15 }
 0x469   : > { %v4933_v0 = vpop.eup %4932  ;;  %v1697_v2 = vpop.xlane.xlu1 %1696  ;;  %4306 = vmatmul.mubr.msk.f32.vlgmr.msra.gmra.mrb[8].mxu1 %vm416_vm0, %v1445_v1  ;;  %v1449_v40 = vmul.f32 %v4931_v5, %v5627_v47  ;;  %v414_v47 = vld [vmem:[%s6338_s3 + $0x78] sm:$0xff]  ;;  %p5044_p3 = pnand %p5043_p2, %p5037_p13 }
 0x46a   : > { %4934 = vrcp.f32 %v1697_v2  ;;  %4656 = vmatpush3.bf16.msra.mxu1 %v5410_v14  ;;  %v1694_v20 = vpop.xlane.xlu0 %1693  ;;  %v1447_v38 = vmul.f32 %v4933_v0, %v5629_v7  ;;  %v413_v7 = vld [vmem:[%s6338_s3 + $0x70] sm:$0xff] }
 0x46b   : > { %4658 = vmatprep.subr.bf16.mxu1 %v5418_v24  ;;  %4936 = vrcp.f32 %v1694_v20  ;;  %v4665_v25 = vpack.c.bf16 %v414_v47, %v413_v7 }
 0x46c   : > { %4308 = vmatprep.mubr.msk.f32.mxu1 %vm416_vm0, %v1447_v38 }
 0x46d   : > { %v1703_v6 = vpop.xlane.xlu1 %1702  ;;  %4309 = vmatmul.mubr.msk.f32.gmra.mrb[10].mxu1 %vm416_vm0, %v1449_v40 }
 0x46e   : > { %4938 = vrcp.f32 %v1703_v6  ;;  %4660 = vmatpush3.bf16.msra.mxu1 %v5418_v24  ;;  %v1700_v48 = vpop.xlane.xlu0 %1699 }
 0x46f   : > { %4940 = vrcp.f32 %v1700_v48  ;;  %4662 = vmatprep.subr.bf16.mxu1 %v4661_v12 }
 0x474   : > { %v4935_v14 = vpop.eup %4934 }
 0x475   : > { %v4937_v13 = vpop.eup %4936  ;;  %v1707_v16 = vmul.f32 %v4935_v14, %v5637_v26 }
 0x476   : > { %v1705_v37 = vmul.f32 %v4937_v13, %v5639_v27 }
 0x478   : > { %v4939_v39 = vpop.eup %4938  ;;  %4333 = vmatprep.mubr.msk.f32.mxu1 %vm416_vm0, %v1705_v37  ;;  %v1926_v37 = vld [vmem:[%s6340_s5 + $0x20] sm:$0xff] }
 0x479   : > { %v4941_v24 = vpop.eup %4940  ;;  %4334 = vmatmul.mubr.msk.f32.vlgmr.msra.gmra.mrb[8].mxu1 %vm416_vm0, %v1707_v16  ;;  %v1711_v57 = vmul.f32 %v4939_v39, %v5645_v11  ;;  %v1819_v11 = vsub.s32 5, %v5274_v51  ;;  %v1927_v16 = vld [vmem:[%s6340_s5 + $0x28] sm:$0xff] }
 0x47a   : > { %v1709_v30 = vmul.f32 %v4941_v24, %v5647_v44  ;;  %4664 = vmatpush3.bf16.msra.mxu1 %v4661_v12  ;;  %v4677_v39 = vpack.c.bf16 %v1927_v16, %v1926_v37  ;;  %v1923_v24 = vld [vmem:[%s6340_s5 + $0x8] sm:$0xff] }
 0x47b   : > { %4666 = vmatprep.subr.bf16.mxu1 %v4665_v25  ;;  %v1820_v44 = vrot.slane %v5282_v58, %v1819_v11 }
 0x47c   : > { %4336 = vmatprep.mubr.msk.f32.mxu1 %vm416_vm0, %v1709_v30 }
 0x47d   : > { %4337 = vmatmul.mubr.msk.f32.gmra.mrb[10].mxu1 %vm416_vm0, %v1711_v57  ;;  %v1928_v57 = vld [vmem:[%s6340_s5 + $0x30] sm:$0xff] }
 0x47e   : > { %4668 = vmatpush3.bf16.msra.mxu1 %v4665_v25  ;;  %v1922_v25 = vld [vmem:[%s6340_s5] sm:$0xff] }
 0x47f   : > { %v4669_v30 = vpack.c.bf16 %v1923_v24, %v1922_v25  ;;  %4678 = vmatprep.subr.bf16.mxu1 %v4677_v39 }
 0x481   : > { %4670 = vmatprep.subr.bf16.mxu0 %v4669_v30 }
 0x482   : > { %4672 = vmatpush3.bf16.msra.mxu0 %v4669_v30 }
 0x54c   : > { %v4335_v26 = vpop.f32.mrb[8].mxu1 }
 0x54d   : > { %v1794_v27 = vpop.f32.mrb[9].mxu1 }
 0x54e   : > { %4347 = vmatprep.mubr.msk.f32.mxu1 %vm416_vm0, %v1794_v27  ;;  %v1924_v27 = vld [vmem:[%s6340_s5 + $0x10] sm:$0xff] }
 0x54f   : > { %4348 = vmatmul.mubr.msk.f32.vlgmr.msra.gmra.mrb[12].mxu1 %vm416_vm0, %v4335_v26  ;;  %v1929_v26 = vld [vmem:[%s6340_s5 + $0x38] sm:$0xff] }
 0x550   : > { %v4338_v21 = vpop.f32.mrb[10].mxu1  ;;  %4680 = vmatpush3.bf16.msra.mxu1 %v4677_v39 }
 0x551   : > { %v1804_v43 = vpop.f32.mrb[11].mxu1 }
 0x552   : > { %4350 = vmatprep.mubr.msk.f32.mxu1 %vm416_vm0, %v1804_v43  ;;  %v1925_v43 = vld [vmem:[%s6340_s5 + $0x18] sm:$0xff] }
 0x553   : > { %4351 = vmatmul.mubr.msk.f32.gmra.mrb[14].mxu1 %vm416_vm0, %v4338_v21  ;;  %v4681_v21 = vpack.c.bf16 %v1929_v26, %v1928_v57 }
 0x555   : > { %4682 = vmatprep.subr.bf16.mxu1 %v4681_v21 }
 0x556   : > { %4684 = vmatpush3.bf16.msra.mxu1 %v4681_v21 }
 0x622   : > { %v4349_v60 = vpop.f32.mrb[12].mxu1 }
 0x623   : > { %v1905_v36 = vadd.f32 %v4349_v60, %v1820_v44  ;;  %v1899_v33 = vpop.f32.mrb[13].mxu1  ;;  %v1930_v60 = vld [vmem:[%s6340_s5 + $0x40] sm:$0xff] }
 0x624   : > { %v1900_v41 = vadd.f32 %v1899_v33, %v1820_v44 }
 0x625   : > { %v5717_v52 = vadd.f32 %v5030_v29, %v1905_v36  ;;  %v1931_v36 = vld [vmem:[%s6340_s5 + $0x48] sm:$0xff] }
 0x626   : > { %v5720_v42 = vadd.f32 %v5031_v55, %v1900_v41  ;;  %v4352_v50 = vpop.f32.mrb[14].mxu1  ;;  %v4685_v33 = vpack.c.bf16 %v1931_v36, %v1930_v60 }
 0x627   : > { %v1915_v62 = vadd.f32 %v4352_v50, %v1820_v44  ;;  %v1909_v53 = vpop.f32.mrb[15].mxu1  ;;  %v1942_v8 = vsel %vm416_vm0, %v5717_v52, 0.0 }
 0x628   : > { %v1910_v54 = vadd.f32 %v1909_v53, %v1820_v44  ;;  %1943 = vadd.xlane.f32.xlu1 %v1942_v8  ;;  %v1939_v58 = vsel %vm416_vm0, %v5720_v42, 0.0  ;;  %v4673_v44 = vpack.c.bf16 %v1925_v43, %v1924_v27 }
 0x629   : > { %v5727_v4 = vadd.f32 %v5032_v61, %v1915_v62  ;;  %1940 = vadd.xlane.f32.xlu0 %v1939_v58 }
 0x62a   : > { %v5730_v63 = vadd.f32 %v5033_v9, %v1910_v54  ;;  %4674 = vmatprep.subr.bf16.mxu0 %v4673_v44 }
 0x62b   : > { %v1948_v3 = vsel %vm416_vm0, %v5727_v4, 0.0  ;;  %4676 = vmatpush3.bf16.msra.mxu0 %v4673_v44 }
 0x62c   : > { %1949 = vadd.xlane.f32.xlu1 %v1948_v3  ;;  %v1945_v10 = vsel %vm416_vm0, %v5730_v63, 0.0  ;;  %4686 = vmatprep.subr.bf16.mxu0 %v4685_v33 }
 0x62d   : > { %1946 = vadd.xlane.f32.xlu0 %v1945_v10  ;;  %v5793_v10 = vld [vmem:[%s6341_s6] sm:$0x3f] }
 0x6b5   : > { %v1944_v19 = vpop.xlane.xlu1 %1943 }
 0x6b6   : > { %v1952_v35 = vmul.f32 0.03125, %v1944_v19  ;;  %v1941_v28 = vpop.xlane.xlu0 %1940  ;;  %v1994_v19 = vrot.slane %v5793_v10, %v5277_v56 }
 0x6b7   : > { %v1951_v15 = vmul.f32 0.03125, %v1941_v28 }
 0x6b8   : > { %v5737_v1 = vsub.f32 %v5717_v52, %v1952_v35 }
 0x6b9   : > { %v5740_v5 = vsub.f32 %v5720_v42, %v1951_v15  ;;  %v1950_v34 = vpop.xlane.xlu1 %1949 }
 0x6ba   : > { %v1954_v46 = vmul.f32 0.03125, %v1950_v34  ;;  %v1947_v0 = vpop.xlane.xlu0 %1946  ;;  %v1960_v2 = vmul.f32 %v5737_v1, %v5737_v1 }
 0x6bb   : > { %v1953_v20 = vmul.f32 0.03125, %v1947_v0  ;;  %v1959_v38 = vmul.f32 %v5740_v5, %v5740_v5 }
 0x6bc   : > { %v5747_v40 = vsub.f32 %v5727_v4, %v1954_v46  ;;  %v1966_v12 = vsel %vm416_vm0, %v1960_v2, 0.0  ;;  %v2002_v46 = vrot.slane %v5793_v10, %v5285_v59 }
 0x6bd   : > { %v5751_v6 = vsub.f32 %v5730_v63, %v1953_v20  ;;  %1967 = vadd.xlane.f32.xlu1 %v1966_v12  ;;  %v1963_v48 = vsel %vm416_vm0, %v1959_v38, 0.0  ;;  %v1932_v38 = vld [vmem:[%s6340_s5 + $0x50] sm:$0xff]  ;;  %v1933_v12 = vld [vmem:[%s6340_s5 + $0x58] sm:$0xff] }
 0x6be   : > { %1964 = vadd.xlane.f32.xlu0 %v1963_v48  ;;  %v1962_v14 = vmul.f32 %v5747_v40, %v5747_v40 }
 0x6bf   : > { %v1961_v7 = vmul.f32 %v5751_v6, %v5751_v6 }
 0x6c0   : > { %v1972_v47 = vsel %vm416_vm0, %v1962_v14, 0.0 }
 0x6c1   : > { %1973 = vadd.xlane.f32.xlu1 %v1972_v47  ;;  %v1969_v13 = vsel %vm416_vm0, %v1961_v7, 0.0 }
 0x6c2   : > { %1970 = vadd.xlane.f32.xlu0 %v1969_v13  ;;  %v4689_v13 = vpack.c.bf16 %v1933_v12, %v1932_v38 }
 0x74a   : > { %v1968_v41 = vpop.xlane.xlu1 %1967 }
 0x74b   : > { %v1976_v29 = vmul.f32 0.03125, %v1968_v41  ;;  %v1965_v55 = vpop.xlane.xlu0 %1964 }
 0x74c   : > { %v1975_v50 = vmul.f32 0.03125, %v1965_v55  ;;  %v2200_v55 = vrot.slane %v5793_v10, %v678_v31 }
 0x74d   : > { %v1980_v62 = vadd.f32 1e-06, %v1976_v29 }
 0x74e   : > { %v1979_v53 = vadd.f32 1e-06, %v1975_v50  ;;  %v1974_v8 = vpop.xlane.xlu1 %1973 }
 0x74f   : > { %4942 = vrsqrt.f32 %v1980_v62  ;;  %v1978_v54 = vmul.f32 0.03125, %v1974_v8  ;;  %v1971_v58 = vpop.xlane.xlu0 %1970 }
 0x750   : > { %4944 = vrsqrt.f32 %v1979_v53  ;;  %v1977_v61 = vmul.f32 0.03125, %v1971_v58 }
 0x751   : > { %v1982_v9 = vadd.f32 1e-06, %v1978_v54 }
 0x752   : > { %v1981_v3 = vadd.f32 1e-06, %v1977_v61 }
 0x753   : > { %4946 = vrsqrt.f32 %v1982_v9 }
 0x754   : > { %4948 = vrsqrt.f32 %v1981_v3 }
 0x759   : > { %v4943_v35 = vpop.eup %4942 }
 0x75a   : > { %v4945_v28 = vpop.eup %4944  ;;  %v1988_v15 = vmul.f32 %v4943_v35, %v5737_v1 }
 0x75b   : > { %v1987_v34 = vmul.f32 %v4945_v28, %v5740_v5 }
 0x75c   : > { %v1996_v0 = vmul.f32 %v1994_v19, %v1988_v15 }
 0x75d   : > { %v4947_v2 = vpop.eup %4946  ;;  %v1995_v20 = vmul.f32 %v1994_v19, %v1987_v34 }
 0x75e   : > { %v4949_v48 = vpop.eup %4948  ;;  %v1990_v14 = vmul.f32 %v4947_v2, %v5747_v40  ;;  %v2004_v7 = vadd.f32 %v2002_v46, %v1996_v0  ;;  %v2111_v40 = vrot.slane %v5793_v10, %v5314_v17 }
 0x75f   : > { %v2003_v1 = vadd.f32 %v2002_v46, %v1995_v20  ;;  %v1989_v5 = vmul.f32 %v4949_v48, %v5751_v6  ;;  %v5825_v6 = vrot.slane %v5793_v10, %v5317_v18 }
 0x760   : > { %v1998_v47 = vmul.f32 %v1994_v19, %v1990_v14 }
 0x761   : > { %4361 = vmatprep.mubr.msk.f32.mxu0 %vm416_vm0, %v2003_v1  ;;  %4375 = vmatprep.mubr.msk.f32.mxu1 %vm416_vm0, %v2003_v1  ;;  %v1997_v37 = vmul.f32 %v1994_v19, %v1989_v5 }
 0x762   : > { %4362 = vmatmul.mubr.msk.f32.vlgmr.msra.gmra.mrb[20].mxu0 %vm416_vm0, %v2004_v7  ;;  %4376 = vmatmul.mubr.msk.f32.vlgmr.msra.gmra.mrb[16].mxu1 %vm416_vm0, %v2004_v7  ;;  %v2006_v25 = vadd.f32 %v2002_v46, %v1998_v47 }
 0x763   : > { %4688 = vmatpush3.bf16.msra.mxu0 %v4685_v33  ;;  %v2005_v16 = vadd.f32 %v2002_v46, %v1997_v37 }
 0x764   : > { %4690 = vmatprep.subr.bf16.mxu0 %v4689_v13 }
 0x765   : > { %4364 = vmatprep.mubr.msk.f32.mxu0 %vm416_vm0, %v2005_v16  ;;  %4378 = vmatprep.mubr.msk.f32.mxu1 %vm416_vm0, %v2005_v16 }
 0x766   : > { %4365 = vmatmul.mubr.msk.f32.gmra.mrb[22].mxu0 %vm416_vm0, %v2006_v25  ;;  %4379 = vmatmul.mubr.msk.f32.gmra.mrb[18].mxu1 %vm416_vm0, %v2006_v25 }
 0x767   : > { %4692 = vmatpush3.bf16.msra.mxu0 %v4689_v13  ;;  %4389 = vmatprep.mubr.msk.f32.mxu0 %vm416_vm0, %v2003_v1 }
 0x76a   : > { %4390 = vmatmul.mubr.msk.f32.vlgmr.msra.gmra.mrb[24].mxu0 %vm416_vm0, %v2004_v7 }
 0x76b   : > { %4392 = vmatprep.mubr.msk.f32.mxu0 %vm416_vm0, %v2005_v16 }
 0x76e   : > { %4393 = vmatmul.mubr.msk.f32.gmra.mrb[26].mxu0 %vm416_vm0, %v2006_v25 }
 0x835   : > { %v4363_v39 = vpop.f32.mrb[20].mxu0  ;;  %v4377_v24 = vpop.f32.mrb[16].mxu1 }
 0x836   : > { %v2184_v30 = vadd.f32 %v4377_v24, %v2111_v40  ;;  %v2089_v57 = vpop.f32.mrb[21].mxu0  ;;  %v2178_v26 = vpop.f32.mrb[17].mxu1  ;;  %v2095_v37 = vadd.f32 %v4363_v39, %v5825_v6 }
 0x837   : > { %v5828_v27 = vadd.f32 %v2089_v57, %v5825_v6  ;;  %v2179_v21 = vadd.f32 %v2178_v26, %v2111_v40 }
 0x838   : > { %v2287_v39 = vmul.f32 %v2095_v37, %v5329_v22 }
 0x839   : > { %v5830_v43 = vpack.c.bf16 %v2184_v30, %v2179_v21  ;;  %v4366_v44 = vpop.f32.mrb[22].mxu0  ;;  %v4380_v60 = vpop.f32.mrb[18].mxu1  ;;  %v2286_v17 = vmul.f32 %v5828_v27, %v5329_v22  ;;  %v2455_v36 = vmul.f32 %v5828_v27, %v5332_v23  ;;  %v2456_v21 = vmul.f32 %v2095_v37, %v5332_v23 }
 0x83a   : > { %v2194_v33 = vadd.f32 %v4380_v60, %v2111_v40  ;;  %v2099_v41 = vpop.f32.mrb[23].mxu0  ;;  %v2188_v29 = vpop.f32.mrb[19].mxu1  ;;  %v2105_v60 = vadd.f32 %v4366_v44, %v5825_v6  ;;  %v2806_v44 = vmul.f32 %v5828_v27, %v5370_v45 }
 0x83b   : > { %v2189_v50 = vadd.f32 %v2188_v29, %v2111_v40  ;;  %4695 = vmatprep.subr.msk.bf16.mxu1 %vm5340_vm1, %v5830_v43  ;;  %4403 = vmatprep.mubr.msk.f32.mxu1 %vm416_vm0, %v2286_v17  ;;  %v2100_v40 = vadd.f32 %v2099_v41, %v5825_v6  ;;  %v3064_v29 = vmul.f32 %v5828_v27, %v5379_v49 }
 0x83c   : > { %4707 = vmatprep.subr.msk.bf16.mxu0 %vm5340_vm1, %v5830_v43  ;;  %4417 = vmatprep.mubr.msk.f32.mxu0 %vm416_vm0, %v2455_v36  ;;  %v2458_v6 = vmul.f32 %v2105_v60, %v5332_v23  ;;  %v2809_v41 = vmul.f32 %v2105_v60, %v5370_v45 }
 0x83d   : > { %v5847_v62 = vpack.c.bf16 %v2194_v33, %v2189_v50  ;;  %4698 = vmatpush3.bf16.xpose.msk.msra.mxu1 %vm5340_vm1, %v5830_v43  ;;  %4710 = vmatpush3.bf16.xpose.msk.msra.mxu0 %vm5340_vm1, %v5830_v43  ;;  %v4391_v31 = vpop.f32.mrb[24].mxu0  ;;  %v2288_v17 = vmul.f32 %v2100_v40, %v5329_v22  ;;  %v2457_v36 = vmul.f32 %v2100_v40, %v5332_v23 }
 0x83e   : > { %v2273_v53 = vadd.f32 %v4391_v31, %v2200_v55  ;;  %v2267_v8 = vpop.f32.mrb[25].mxu0  ;;  %v2289_v33 = vmul.f32 %v2105_v60, %v5329_v22  ;;  %v5956_v31 = vld [vmem:[%s6336_s1 + $0x28] sm:$0xff] }
 0x83f   : > { %v2268_v54 = vadd.f32 %v2267_v8, %v2200_v55  ;;  %4701 = vmatprep.subr.msk.bf16.mxu1 %vm5340_vm1, %v5847_v62  ;;  %4713 = vmatprep.subr.msk.bf16.mxu0 %vm5340_vm1, %v5847_v62  ;;  %v5961_v8 = vld [vmem:[%s6336_s1 + $0x20] sm:$0xff] }
 0x840   : > { %v2609_v58 = vmul.f32 %v2273_v53, %v5332_v23  ;;  %v2452_v61 = vmul.f32 %v2273_v53, %v5329_v22  ;;  %v2960_v9 = vmul.f32 %v2273_v53, %v5370_v45  ;;  %v3218_v3 = vmul.f32 %v2273_v53, %v5379_v49 }
 0x841   : > { %v4394_v19 = vpop.f32.mrb[26].mxu0  ;;  %v2608_v35 = vmul.f32 %v2268_v54, %v5332_v23  ;;  %v2451_v28 = vmul.f32 %v2268_v54, %v5329_v22  ;;  %v2959_v15 = vmul.f32 %v2268_v54, %v5370_v45  ;;  %v3217_v34 = vmul.f32 %v2268_v54, %v5379_v49 }
 0x842   : > { %v2283_v46 = vadd.f32 %v4394_v19, %v2200_v55  ;;  %v2277_v0 = vpop.f32.mrb[27].mxu0  ;;  %v5977_v19 = vld [vmem:[%s6336_s1 + $0x30] sm:$0xff] }
 0x843   : > { %v2278_v2 = vadd.f32 %v2277_v0, %v2200_v55  ;;  %v4717_v20 = vpack.c.bf16 %v2609_v58, %v2608_v35  ;;  %v5869_v38 = vpack.c.bf16 %v2452_v61, %v2451_v28  ;;  %v5871_v12 = vpack.c.bf16 %v2960_v9, %v2959_v15 }
 0x844   : > { %v2611_v48 = vmul.f32 %v2283_v46, %v5332_v23  ;;  %v2454_v14 = vmul.f32 %v2283_v46, %v5329_v22  ;;  %v2962_v1 = vmul.f32 %v2283_v46, %v5370_v45  ;;  %v5876_v5 = vpack.c.bf16 %v3218_v3, %v3217_v34  ;;  %v5972_v3 = vld [vmem:[%s6336_s1 + $0x38] sm:$0xff] }
 0x845   : > { %4704 = vmatpush3.bf16.xpose.msk.msra.mxu1 %vm5340_vm1, %v5847_v62  ;;  %4716 = vmatpush3.bf16.xpose.msk.msra.mxu0 %vm5340_vm1, %v5847_v62  ;;  %v2610_v7 = vmul.f32 %v2278_v2, %v5332_v23  ;;  %v2453_v47 = vmul.f32 %v2278_v2, %v5329_v22  ;;  %v2961_v13 = vmul.f32 %v2278_v2, %v5370_v45 }
 0x846   : > { %4718 = vmatprep.subr.bf16.mxu1 %v4717_v20  ;;  %4735 = vmatprep.subr.msk.bf16.mxu0 %vm5340_vm1, %v5830_v43  ;;  %v3219_v16 = vmul.f32 %v2278_v2, %v5379_v49  ;;  %v3220_v25 = vmul.f32 %v2283_v46, %v5379_v49  ;;  %v2807_v22 = vmul.f32 %v2095_v37, %v5370_v45 }
 0x847   : > { %v4721_v24 = vpack.c.bf16 %v2611_v48, %v2610_v7  ;;  %v5894_v30 = vpack.c.bf16 %v2454_v14, %v2453_v47  ;;  %v5896_v57 = vpack.c.bf16 %v2962_v1, %v2961_v13  ;;  %v2808_v23 = vmul.f32 %v2100_v40, %v5370_v45 }
 0x848   : > { %v5898_v26 = vpack.c.bf16 %v3220_v25, %v3219_v16  ;;  %v3065_v55 = vmul.f32 %v2095_v37, %v5379_v49  ;;  %v3067_v45 = vmul.f32 %v2105_v60, %v5379_v49 }
 0x84c   : > { %4404 = vmatmul.mubr.msk.f32.vlgmr.msra.gmra.mrb[20].mxu1 %vm416_vm0, %v2287_v39  ;;  %4418 = vmatmul.mubr.msk.f32.vlgmr.msra.gmra.mrb[28].mxu0 %vm416_vm0, %v2456_v21 }
 0x84d   : > { %4406 = vmatprep.mubr.msk.f32.mxu1 %vm416_vm0, %v2288_v17  ;;  %4420 = vmatprep.mubr.msk.f32.mxu0 %vm416_vm0, %v2457_v36 }
 0x84e   : > { %4720 = vmatpush3.bf16.msra.mxu1 %v4717_v20  ;;  %4738 = vmatpush3.bf16.xpose.msk.msra.mxu0 %vm5340_vm1, %v5830_v43 }
 0x84f   : > { %4722 = vmatprep.subr.bf16.mxu1 %v4721_v24  ;;  %4741 = vmatprep.subr.msk.bf16.mxu0 %vm5340_vm1, %v5847_v62 }
 0x850   : > { %4407 = vmatmul.mubr.msk.f32.gmra.mrb[22].mxu1 %vm416_vm0, %v2289_v33  ;;  %4421 = vmatmul.mubr.msk.f32.gmra.mrb[30].mxu0 %vm416_vm0, %v2458_v6 }
 0x851   : > { %4459 = vmatprep.mubr.msk.f32.mxu0 %vm416_vm0, %v2806_v44 }
 0x852   : > { %4724 = vmatpush3.bf16.msra.mxu1 %v4721_v24 }
 0x853   : > { %4726 = vmatprep.subr.bf16.mxu1 %v5869_v38 }
 0x856   : > { %4744 = vmatpush3.bf16.xpose.msk.msra.mxu0 %vm5340_vm1, %v5847_v62 }
 0x857   : > { %4755 = vmatprep.subr.msk.bf16.mxu0 %vm5340_vm1, %v5830_v43 }
 0x85d   : > { %4460 = vmatmul.mubr.msk.f32.vlgmr.msra.gmra.mrb[32].mxu0 %vm416_vm0, %v2807_v22 }
 0x85e   : > { %4462 = vmatprep.mubr.msk.f32.mxu0 %vm416_vm0, %v2808_v23  ;;  %4758 = vmatpush3.bf16.xpose.msk.msra.mxu0 %vm5340_vm1, %v5830_v43  ;;  %v3066_v43 = vmul.f32 %v2100_v40, %v5379_v49 }
 0x85f   : > { %4761 = vmatprep.subr.msk.bf16.mxu0 %vm5340_vm1, %v5847_v62 }
 0x861   : > { %4463 = vmatmul.mubr.msk.f32.gmra.mrb[34].mxu0 %vm416_vm0, %v2809_v41 }
 0x862   : > { %4487 = vmatprep.mubr.msk.f32.mxu0 %vm416_vm0, %v3064_v29 }
 0x866   : > { %4764 = vmatpush3.bf16.xpose.msk.msra.mxu0 %vm5340_vm1, %v5847_v62 }
 0x86d   : > { %4488 = vmatmul.mubr.msk.f32.vlgmr.msra.gmra.mrb[36].mxu0 %vm416_vm0, %v3065_v55 }
 0x86e   : > { %4490 = vmatprep.mubr.msk.f32.mxu0 %vm416_vm0, %v3066_v43 }
 0x871   : > { %4491 = vmatmul.mubr.msk.f32.gmra.mrb[38].mxu0 %vm416_vm0, %v3067_v45 }
 0x91f   : > { %v4405_v27 = vpop.f32.mrb[20].mxu1  ;;  %v4419_v50 = vpop.f32.mrb[28].mxu0 }
 0x920   : > { %v2557_v32 = vmul.f32 0.35355338, %v4419_v50  ;;  %v2380_v62 = vpop.f32.mrb[21].mxu1  ;;  %v2537_v53 = vpop.f32.mrb[29].mxu0  ;;  %v2400_v35 = vmul.f32 0.35355338, %v4405_v27 }
 0x921   : > { %v2556_v54 = vmul.f32 0.35355338, %v2537_v53  ;;  %v2399_v46 = vmul.f32 0.35355338, %v2380_v62 }
 0x922   : > { %v5964_v49 = vadd.f32 %v5956_v31, %v2557_v32  ;;  %v5992_v7 = vadd.f32 %v5956_v31, %v2400_v35 }
 0x923   : > { %v4408_v58 = vpop.f32.mrb[22].mxu1  ;;  %v4422_v61 = vpop.f32.mrb[30].mxu0  ;;  %v5967_v9 = vadd.f32 %v5961_v8, %v2556_v54  ;;  %v5997_v16 = vadd.f32 %v5961_v8, %v2399_v46 }
 0x924   : > { %v2559_v28 = vmul.f32 0.35355338, %v4422_v61  ;;  %v2390_v15 = vpop.f32.mrb[23].mxu1  ;;  %v2547_v34 = vpop.f32.mrb[31].mxu0  ;;  %v2567_v2 = vsel %vm416_vm0, %v5964_v49, -inf  ;;  %v2410_v25 = vsel %vm416_vm0, %v5992_v7, -inf }
 0x925   : > { %v2558_v0 = vmul.f32 0.35355338, %v2547_v34  ;;  %v2564_v20 = vsel %vm416_vm0, %v5967_v9, -inf  ;;  %2568 = vmax.xlane.f32.xlu1 %v2567_v2  ;;  %v2402_v47 = vmul.f32 0.35355338, %v4408_v58  ;;  %v2407_v40 = vsel %vm416_vm0, %v5997_v16, -inf }
 0x926   : > { %2565 = vmax.xlane.f32.xlu0 %v2564_v20  ;;  %v5984_v48 = vadd.f32 %v5972_v3, %v2559_v28  ;;  %v2401_v13 = vmul.f32 0.35355338, %v2390_v15 }
 0x927   : > { %v5987_v14 = vadd.f32 %v5977_v19, %v2558_v0  ;;  %v6004_v24 = vadd.f32 %v5972_v3, %v2402_v47 }
 0x928   : > { %v2573_v1 = vsel %vm416_vm0, %v5984_v48, -inf  ;;  %v6007_v39 = vadd.f32 %v5977_v19, %v2401_v13 }
 0x929   : > { %v2570_v37 = vsel %vm416_vm0, %v5987_v14, -inf  ;;  %2574 = vmax.xlane.f32.xlu1 %v2573_v1  ;;  %v2416_v36 = vsel %vm416_vm0, %v6004_v24, -inf }
 0x92a   : > { %2571 = vmax.xlane.f32.xlu0 %v2570_v37  ;;  %v2413_v33 = vsel %vm416_vm0, %v6007_v39, -inf }
 0x92d   : > { %2411 = vmax.xlane.f32.xlu1 %v2410_v25 }
 0x92e   : > { %2408 = vmax.xlane.f32.xlu0 %v2407_v40 }
 0x930   : > { %v4461_v21 = vpop.f32.mrb[32].mxu0 }
 0x931   : > { %v2908_v60 = vmul.f32 0.35355338, %v4461_v21  ;;  %v2888_v17 = vpop.f32.mrb[33].mxu0  ;;  %2417 = vmax.xlane.f32.xlu1 %v2416_v36 }
 0x932   : > { %v2907_v6 = vmul.f32 0.35355338, %v2888_v17  ;;  %2414 = vmax.xlane.f32.xlu0 %v2413_v33 }
 0x933   : > { %v6014_v44 = vadd.f32 %v5956_v31, %v2908_v60 }
 0x934   : > { %v4464_v22 = vpop.f32.mrb[34].mxu0  ;;  %v6017_v23 = vadd.f32 %v5961_v8, %v2907_v6 }
 0x935   : > { %v2910_v41 = vmul.f32 0.35355338, %v4464_v22  ;;  %v2898_v29 = vpop.f32.mrb[35].mxu0  ;;  %v2918_v55 = vsel %vm416_vm0, %v6014_v44, -inf }
 0x936   : > { %v2909_v43 = vmul.f32 0.35355338, %v2898_v29  ;;  %2919 = vmax.xlane.f32.xlu1 %v2918_v55  ;;  %v2915_v45 = vsel %vm416_vm0, %v6017_v23, -inf }
 0x937   : > { %2916 = vmax.xlane.f32.xlu0 %v2915_v45  ;;  %v6024_v27 = vadd.f32 %v5972_v3, %v2910_v41 }
 0x938   : > { %v6027_v50 = vadd.f32 %v5977_v19, %v2909_v43 }
 0x939   : > { %v2924_v32 = vsel %vm416_vm0, %v6024_v27, -inf }
 0x93a   : > { %2925 = vmax.xlane.f32.xlu1 %v2924_v32  ;;  %v2921_v62 = vsel %vm416_vm0, %v6027_v50, -inf }
 0x93b   : > { %2922 = vmax.xlane.f32.xlu0 %v2921_v62 }
 0x940   : > { %v4489_v53 = vpop.f32.mrb[36].mxu0 }
 0x941   : > { %v3166_v54 = vmul.f32 0.35355338, %v4489_v53  ;;  %v3146_v58 = vpop.f32.mrb[37].mxu0 }
 0x942   : > { %v3165_v61 = vmul.f32 0.35355338, %v3146_v58 }
 0x943   : > { %v6034_v35 = vadd.f32 %v5956_v31, %v3166_v54 }
 0x944   : > { %v4492_v28 = vpop.f32.mrb[38].mxu0  ;;  %v6037_v15 = vadd.f32 %v5961_v8, %v3165_v61 }
 0x945   : > { %v3168_v34 = vmul.f32 0.35355338, %v4492_v28  ;;  %v3156_v46 = vpop.f32.mrb[39].mxu0  ;;  %v3176_v0 = vsel %vm416_vm0, %v6034_v35, -inf }
 0x946   : > { %v3167_v2 = vmul.f32 0.35355338, %v3156_v46  ;;  %3177 = vmax.xlane.f32.xlu1 %v3176_v0  ;;  %v3173_v20 = vsel %vm416_vm0, %v6037_v15, -inf }
 0x947   : > { %3174 = vmax.xlane.f32.xlu0 %v3173_v20  ;;  %v6044_v1 = vadd.f32 %v5972_v3, %v3168_v34 }
 0x948   : > { %v6047_v31 = vadd.f32 %v5977_v19, %v3167_v2 }
 0x949   : > { %v3182_v8 = vsel %vm416_vm0, %v6044_v1, -inf }
 0x94a   : > { %3183 = vmax.xlane.f32.xlu1 %v3182_v8  ;;  %v3179_v47 = vsel %vm416_vm0, %v6047_v31, -inf }
 0x94b   : > { %3180 = vmax.xlane.f32.xlu0 %v3179_v47 }
 0x9b2   : > { %v2569_v13 = vpop.xlane.xlu1 %2568 }
 0x9b3   : > { %v2566_v37 = vpop.xlane.xlu0 %2565  ;;  %v2577_v25 = vsub.f32 %v5964_v49, %v2569_v13 }
 0x9b4   : > { %v2576_v40 = vsub.f32 %v5967_v9, %v2566_v37 }
 0x9b5   : > { %v2582_v21 = vmul.f32 1.442695, %v2577_v25 }
 0x9b6   : > { %v2580_v3 = vmul.f32 1.442695, %v2576_v40  ;;  %v2575_v60 = vpop.xlane.xlu1 %2574 }
 0x9b7   : > { %v2572_v17 = vpop.xlane.xlu0 %2571  ;;  %4950 = vpow2.f32 %v2582_v21  ;;  %v2579_v19 = vsub.f32 %v5984_v48, %v2575_v60 }
 0x9b8   : > { %v2578_v36 = vsub.f32 %v5987_v14, %v2572_v17  ;;  %4952 = vpow2.f32 %v2580_v3 }
 0x9b9   : > { %v2586_v33 = vmul.f32 1.442695, %v2579_v19 }
 0x9ba   : > { %v2584_v6 = vmul.f32 1.442695, %v2578_v36  ;;  %v2412_v22 = vpop.xlane.xlu1 %2411 }
 0x9bb   : > { %v2409_v41 = vpop.xlane.xlu0 %2408  ;;  %4954 = vpow2.f32 %v2586_v33  ;;  %v2420_v29 = vsub.f32 %v5992_v7, %v2412_v22 }
 0x9bc   : > { %v2419_v49 = vsub.f32 %v5997_v16, %v2409_v41  ;;  %4956 = vpow2.f32 %v2584_v6 }
 0x9bd   : > { %v2425_v9 = vmul.f32 1.442695, %v2420_v29 }
 0x9be   : > { %v2423_v55 = vmul.f32 1.442695, %v2419_v49  ;;  %v2418_v43 = vpop.xlane.xlu1 %2417 }
 0x9bf   : > { %v2415_v45 = vpop.xlane.xlu0 %2414  ;;  %4958 = vpow2.f32 %v2425_v9  ;;  %v2422_v48 = vsub.f32 %v6004_v24, %v2418_v43 }
 0x9c0   : > { %v2421_v14 = vsub.f32 %v6007_v39, %v2415_v45  ;;  %4960 = vpow2.f32 %v2423_v55 }
 0x9c1   : > { %v6061_v32 = vpop.eup %4950  ;;  %v2429_v62 = vmul.f32 1.442695, %v2422_v48 }
 0x9c2   : > { %v2427_v53 = vmul.f32 1.442695, %v2421_v14  ;;  %v6063_v54 = vpop.eup %4952  ;;  %v2591_v16 = vsel %vm416_vm0, %v6061_v32, 0.0 }
 0x9c3   : > { %v2920_v7 = vpop.xlane.xlu1 %2919  ;;  %4962 = vpow2.f32 %v2429_v62  ;;  %2592 = vadd.xlane.f32.xlu1 %v2591_v16  ;;  %v2588_v24 = vsel %vm416_vm0, %v6063_v54, 0.0 }
 0x9c4   : > { %v2928_v58 = vsub.f32 %v6014_v44, %v2920_v7  ;;  %v2917_v61 = vpop.xlane.xlu0 %2916  ;;  %4964 = vpow2.f32 %v2427_v53  ;;  %2589 = vadd.xlane.f32.xlu0 %v2588_v24 }
 0x9c5   : > { %v2927_v39 = vsub.f32 %v6017_v23, %v2917_v61  ;;  %v6071_v28 = vpop.eup %4954 }
 0x9c6   : > { %v2933_v34 = vmul.f32 1.442695, %v2928_v58  ;;  %v6073_v46 = vpop.eup %4956  ;;  %v2597_v20 = vsel %vm416_vm0, %v6071_v28, 0.0 }
 0x9c7   : > { %v2931_v0 = vmul.f32 1.442695, %v2927_v39  ;;  %v2926_v2 = vpop.xlane.xlu1 %2925  ;;  %2598 = vadd.xlane.f32.xlu1 %v2597_v20  ;;  %v2594_v47 = vsel %vm416_vm0, %v6073_v46, 0.0 }
 0x9c8   : > { %4966 = vpow2.f32 %v2933_v34  ;;  %v2930_v44 = vsub.f32 %v6024_v27, %v2926_v2  ;;  %v2923_v8 = vpop.xlane.xlu0 %2922  ;;  %2595 = vadd.xlane.f32.xlu0 %v2594_v47 }
 0x9c9   : > { %4968 = vpow2.f32 %v2931_v0  ;;  %v2929_v23 = vsub.f32 %v6027_v50, %v2923_v8  ;;  %v6081_v13 = vpop.eup %4958 }
 0x9ca   : > { %v2937_v37 = vmul.f32 1.442695, %v2930_v44  ;;  %v6083_v25 = vpop.eup %4960  ;;  %v2434_v21 = vsel %vm416_vm0, %v6081_v13, 0.0 }
 0x9cb   : > { %v2935_v40 = vmul.f32 1.442695, %v2929_v23  ;;  %2435 = vadd.xlane.f32.xlu1 %v2434_v21  ;;  %v2431_v27 = vsel %vm416_vm0, %v6083_v25, 0.0 }
 0x9cc   : > { %4970 = vpow2.f32 %v2937_v37  ;;  %2432 = vadd.xlane.f32.xlu0 %v2431_v27 }
 0x9cd   : > { %4972 = vpow2.f32 %v2935_v40  ;;  %v6089_v3 = vpop.eup %4962 }
 0x9ce   : > { %v6091_v50 = vpop.eup %4964  ;;  %v2440_v60 = vsel %vm416_vm0, %v6089_v3, 0.0 }
 0x9cf   : > { %2441 = vadd.xlane.f32.xlu1 %v2440_v60  ;;  %v2437_v17 = vsel %vm416_vm0, %v6091_v50, 0.0 }
 0x9d0   : > { %2438 = vadd.xlane.f32.xlu0 %v2437_v17 }
 0x9d2   : > { %v6097_v19 = vpop.eup %4966 }
 0x9d3   : > { %v6099_v36 = vpop.eup %4968  ;;  %v3178_v33 = vpop.xlane.xlu1 %3177  ;;  %v2942_v6 = vsel %vm416_vm0, %v6097_v19, 0.0 }
 0x9d4   : > { %v3186_v22 = vsub.f32 %v6034_v35, %v3178_v33  ;;  %2943 = vadd.xlane.f32.xlu1 %v2942_v6  ;;  %v3175_v41 = vpop.xlane.xlu0 %3174  ;;  %v2939_v29 = vsel %vm416_vm0, %v6099_v36, 0.0 }
 0x9d5   : > { %v3185_v49 = vsub.f32 %v6037_v15, %v3175_v41  ;;  %2940 = vadd.xlane.f32.xlu0 %v2939_v29 }
 0x9d6   : > { %v6107_v9 = vpop.eup %4970  ;;  %v3191_v55 = vmul.f32 1.442695, %v3186_v22 }
 0x9d7   : > { %v6109_v43 = vpop.eup %4972  ;;  %v3189_v45 = vmul.f32 1.442695, %v3185_v49  ;;  %v3184_v48 = vpop.xlane.xlu1 %3183  ;;  %v2948_v14 = vsel %vm416_vm0, %v6107_v9, 0.0 }
 0x9d8   : > { %4974 = vpow2.f32 %v3191_v55  ;;  %v3188_v35 = vsub.f32 %v6044_v1, %v3184_v48  ;;  %2949 = vadd.xlane.f32.xlu1 %v2948_v14  ;;  %v3181_v62 = vpop.xlane.xlu0 %3180  ;;  %v2945_v53 = vsel %vm416_vm0, %v6109_v43, 0.0 }
 0x9d9   : > { %4976 = vpow2.f32 %v3189_v45  ;;  %v3187_v15 = vsub.f32 %v6047_v31, %v3181_v62  ;;  %2946 = vadd.xlane.f32.xlu0 %v2945_v53 }
 0x9da   : > { %v3195_v7 = vmul.f32 1.442695, %v3188_v35 }
 0x9db   : > { %v3193_v16 = vmul.f32 1.442695, %v3187_v15 }
 0x9dc   : > { %4978 = vpow2.f32 %v3195_v7 }
 0x9dd   : > { %4980 = vpow2.f32 %v3193_v16 }
 0x9e2   : > { %v6117_v58 = vpop.eup %4974 }
 0x9e3   : > { %v6119_v61 = vpop.eup %4976  ;;  %v3200_v1 = vsel %vm416_vm0, %v6117_v58, 0.0 }
 0x9e4   : > { %3201 = vadd.xlane.f32.xlu1 %v3200_v1  ;;  %v3197_v24 = vsel %vm416_vm0, %v6119_v61, 0.0 }
 0x9e5   : > { %3198 = vadd.xlane.f32.xlu0 %v3197_v24 }
 0x9e6   : > { %v6125_v39 = vpop.eup %4978 }
 0x9e7   : > { %v6127_v31 = vpop.eup %4980  ;;  %v3206_v34 = vsel %vm416_vm0, %v6125_v39, 0.0 }
 0x9e8   : > { %3207 = vadd.xlane.f32.xlu1 %v3206_v34  ;;  %v3203_v0 = vsel %vm416_vm0, %v6127_v31, 0.0 }
 0x9e9   : > { %3204 = vadd.xlane.f32.xlu0 %v3203_v0 }
 0xa50   : > { %v2593_v2 = vpop.xlane.xlu1 %2592 }
 0xa51   : > { %4982 = vrcp.f32 %v2593_v2  ;;  %v2590_v20 = vpop.xlane.xlu0 %2589 }
 0xa52   : > { %4984 = vrcp.f32 %v2590_v20 }
 0xa54   : > { %v2599_v44 = vpop.xlane.xlu1 %2598 }
 0xa55   : > { %4986 = vrcp.f32 %v2599_v44  ;;  %v2596_v8 = vpop.xlane.xlu0 %2595 }
 0xa56   : > { %4988 = vrcp.f32 %v2596_v8 }
 0xa58   : > { %v2436_v47 = vpop.xlane.xlu1 %2435 }
 0xa59   : > { %4990 = vrcp.f32 %v2436_v47  ;;  %v2433_v23 = vpop.xlane.xlu0 %2432 }
 0xa5a   : > { %4992 = vrcp.f32 %v2433_v23 }
 0xa5b   : > { %v4983_v37 = vpop.eup %4982 }
 0xa5c   : > { %v4985_v40 = vpop.eup %4984  ;;  %v2442_v21 = vpop.xlane.xlu1 %2441  ;;  %v2603_v17 = vmul.f32 %v4983_v37, %v6061_v32 }
 0xa5d   : > { %4994 = vrcp.f32 %v2442_v21  ;;  %v2439_v27 = vpop.xlane.xlu0 %2438  ;;  %v2601_v60 = vmul.f32 %v4985_v40, %v6063_v54 }
 0xa5e   : > { %4996 = vrcp.f32 %v2439_v27 }
 0xa5f   : > { %v4987_v33 = vpop.eup %4986  ;;  %4431 = vmatprep.mubr.msk.f32.mxu1 %vm416_vm0, %v2601_v60 }
 0xa60   : > { %v4989_v6 = vpop.eup %4988  ;;  %4432 = vmatmul.mubr.msk.f32.vlgmr.msra.gmra.mrb[24].mxu1 %vm416_vm0, %v2603_v17  ;;  %v2607_v54 = vmul.f32 %v4987_v33, %v6071_v28 }
 0xa61   : > { %v2944_v22 = vpop.xlane.xlu1 %2943  ;;  %4728 = vmatpush3.bf16.msra.mxu1 %v5869_v38  ;;  %v2605_v29 = vmul.f32 %v4989_v6, %v6073_v46 }
 0xa62   : > { %4998 = vrcp.f32 %v2944_v22  ;;  %v2941_v41 = vpop.xlane.xlu0 %2940  ;;  %4730 = vmatprep.subr.bf16.mxu1 %v5894_v30 }
 0xa63   : > { %5000 = vrcp.f32 %v2941_v41  ;;  %v4991_v32 = vpop.eup %4990  ;;  %4434 = vmatprep.mubr.msk.f32.mxu1 %vm416_vm0, %v2605_v29 }
 0xa64   : > { %v4993_v49 = vpop.eup %4992  ;;  %4435 = vmatmul.mubr.msk.f32.gmra.mrb[26].mxu1 %vm416_vm0, %v2607_v54  ;;  %v2446_v46 = vmul.f32 %v4991_v32, %v6081_v13 }
 0xa65   : > { %v2950_v55 = vpop.xlane.xlu1 %2949  ;;  %4732 = vmatpush3.bf16.msra.mxu1 %v5894_v30  ;;  %v2444_v38 = vmul.f32 %v4993_v49, %v6083_v25 }
 0xa66   : > { %5002 = vrcp.f32 %v2950_v55  ;;  %v2947_v45 = vpop.xlane.xlu0 %2946  ;;  %4746 = vmatprep.subr.bf16.mxu1 %v5871_v12 }
 0xa67   : > { %5004 = vrcp.f32 %v2947_v45  ;;  %v4995_v48 = vpop.eup %4994  ;;  %4445 = vmatprep.mubr.msk.f32.mxu1 %vm416_vm0, %v2444_v38 }
 0xa68   : > { %v4997_v28 = vpop.eup %4996  ;;  %4446 = vmatmul.mubr.msk.f32.vlgmr.msra.gmra.mrb[24].mxu1 %vm416_vm0, %v2446_v46  ;;  %v2450_v30 = vmul.f32 %v4995_v48, %v6089_v3  ;;  %v1934_v3 = vld [vmem:[%s6340_s5 + $0x60] sm:$0xff] }
 0xa69   : > { %4748 = vmatpush3.bf16.msra.mxu1 %v5871_v12  ;;  %v2448_v14 = vmul.f32 %v4997_v28, %v6091_v50  ;;  %v1935_v50 = vld [vmem:[%s6340_s5 + $0x68] sm:$0xff] }
 0xa6a   : > { %4750 = vmatprep.subr.bf16.mxu1 %v5896_v57  ;;  %v4773_v7 = vpack.c.bf16 %v1935_v50, %v1934_v3  ;;  %v3496_v50 = vld [vmem:[%s6342_s7] sm:$0xff] }
 0xa6b   : > { %4448 = vmatprep.mubr.msk.f32.mxu1 %vm416_vm0, %v2448_v14 }
 0xa6c   : > { %v4999_v25 = vpop.eup %4998  ;;  %4449 = vmatmul.mubr.msk.f32.gmra.mrb[26].mxu1 %vm416_vm0, %v2450_v30 }
 0xa6d   : > { %v5001_v13 = vpop.eup %5000  ;;  %4752 = vmatpush3.bf16.msra.mxu1 %v5896_v57  ;;  %v2954_v62 = vmul.f32 %v4999_v25, %v6097_v19 }
 0xa6e   : > { %v2952_v35 = vmul.f32 %v5001_v13, %v6099_v36  ;;  %4766 = vmatprep.subr.bf16.mxu1 %v5876_v5 }
 0xa70   : > { %v5003_v12 = vpop.eup %5002  ;;  %4473 = vmatprep.mubr.msk.f32.mxu1 %vm416_vm0, %v2952_v35 }
 0xa71   : > { %v5005_v53 = vpop.eup %5004  ;;  %v3202_v15 = vpop.xlane.xlu1 %3201  ;;  %4474 = vmatmul.mubr.msk.f32.vlgmr.msra.gmra.mrb[24].mxu1 %vm416_vm0, %v2954_v62  ;;  %v2958_v36 = vmul.f32 %v5003_v12, %v6107_v9  ;;  %v1937_v9 = vld [vmem:[%s6340_s5 + $0x78] sm:$0xff] }
 0xa72   : > { %5006 = vrcp.f32 %v3202_v15  ;;  %4768 = vmatpush3.bf16.msra.mxu1 %v5876_v5  ;;  %v3199_v57 = vpop.xlane.xlu0 %3198  ;;  %v2956_v19 = vmul.f32 %v5005_v53, %v6109_v43  ;;  %v1936_v43 = vld [vmem:[%s6340_s5 + $0x70] sm:$0xff]  ;;  %v3497_v53 = vld [vmem:[%s6342_s7 + $0x8] sm:$0xff] }
 0xa73   : > { %4770 = vmatprep.subr.bf16.mxu1 %v5898_v26  ;;  %5008 = vrcp.f32 %v3199_v57  ;;  %v4777_v2 = vpack.c.bf16 %v1937_v9, %v1936_v43  ;;  %v4781_v15 = vpack.c.bf16 %v3497_v53, %v3496_v50  ;;  %v3498_v57 = vld [vmem:[%s6342_s7 + $0x10] sm:$0xff] }
 0xa74   : > { %4476 = vmatprep.mubr.msk.f32.mxu1 %vm416_vm0, %v2956_v19  ;;  %v3499_v19 = vld [vmem:[%s6342_s7 + $0x18] sm:$0xff] }
 0xa75   : > { %v3208_v16 = vpop.xlane.xlu1 %3207  ;;  %4477 = vmatmul.mubr.msk.f32.gmra.mrb[26].mxu1 %vm416_vm0, %v2958_v36  ;;  %4782 = vmatprep.subr.bf16.mxu0 %v4781_v15  ;;  %v4785_v36 = vpack.c.bf16 %v3499_v19, %v3498_v57 }
 0xa76   : > { %5010 = vrcp.f32 %v3208_v16  ;;  %4772 = vmatpush3.bf16.msra.mxu1 %v5898_v26  ;;  %v3205_v1 = vpop.xlane.xlu0 %3204  ;;  %4784 = vmatpush3.bf16.msra.mxu0 %v4781_v15 }
 0xa77   : > { %5012 = vrcp.f32 %v3205_v1  ;;  %4774 = vmatprep.subr.bf16.mxu1 %v4773_v7  ;;  %4786 = vmatprep.subr.bf16.mxu0 %v4785_v36 }
 0xa7a   : > { %4788 = vmatpush3.bf16.msra.mxu0 %v4785_v36 }
 0xa7c   : > { %v5007_v5 = vpop.eup %5006 }
 0xa7d   : > { %v5009_v24 = vpop.eup %5008  ;;  %v3212_v0 = vmul.f32 %v5007_v5, %v6117_v58 }
 0xa7e   : > { %v3210_v34 = vmul.f32 %v5009_v24, %v6119_v61 }
 0xa80   : > { %v5011_v20 = vpop.eup %5010  ;;  %4501 = vmatprep.mubr.msk.f32.mxu1 %vm416_vm0, %v3210_v34 }
 0xa81   : > { %v5013_v26 = vpop.eup %5012  ;;  %4502 = vmatmul.mubr.msk.f32.vlgmr.msra.gmra.mrb[24].mxu1 %vm416_vm0, %v3212_v0  ;;  %v3216_v8 = vmul.f32 %v5011_v20, %v6125_v39  ;;  %v3325_v39 = vrot.slane %v5793_v10, %v1819_v11 }
 0xa82   : > { %v3214_v44 = vmul.f32 %v5013_v26, %v6127_v31  ;;  %4776 = vmatpush3.bf16.msra.mxu1 %v4773_v7 }
 0xa83   : > { %4778 = vmatprep.subr.bf16.mxu1 %v4777_v2 }
 0xa84   : > { %4504 = vmatprep.mubr.msk.f32.mxu1 %vm416_vm0, %v3214_v44  ;;  %v6238_v44 = vld [vmem:[%s6345_s10] sm:$0x7] }
 0xa85   : > { %4505 = vmatmul.mubr.msk.f32.gmra.mrb[26].mxu1 %vm416_vm0, %v3216_v8  ;;  %v3483_v8 = vrot.slane %v6238_v44, %v5277_v56 }
 0xa86   : > { %4780 = vmatpush3.bf16.msra.mxu1 %v4777_v2 }
 0xb54   : > { %v4503_v61 = vpop.f32.mrb[24].mxu1 }
 0xb55   : > { %v3299_v58 = vpop.f32.mrb[25].mxu1 }
 0xb56   : > { %4515 = vmatprep.mubr.msk.f32.mxu1 %vm416_vm0, %v3299_v58 }
 0xb57   : > { %4516 = vmatmul.mubr.msk.f32.vlgmr.msra.gmra.mrb[28].mxu1 %vm416_vm0, %v4503_v61 }
 0xb58   : > { %v4506_v47 = vpop.f32.mrb[26].mxu1 }
 0xb59   : > { %v3309_v23 = vpop.f32.mrb[27].mxu1 }
 0xb5a   : > { %4518 = vmatprep.mubr.msk.f32.mxu1 %vm416_vm0, %v3309_v23 }
 0xb5b   : > { %4519 = vmatmul.mubr.msk.f32.gmra.mrb[30].mxu1 %vm416_vm0, %v4506_v47 }
 0xc2a   : > { %v4517_v31 = vpop.f32.mrb[28].mxu1 }
 0xc2b   : > { %v3410_v37 = vadd.f32 %v4517_v31, %v3325_v39  ;;  %v3404_v40 = vpop.f32.mrb[29].mxu1 }
 0xc2c   : > { %v3405_v21 = vadd.f32 %v3404_v40, %v3325_v39 }
 0xc2d   : > { %v6196_v27 = vadd.f32 %v3410_v37, %v5717_v52 }
 0xc2e   : > { %v6199_v60 = vadd.f32 %v3405_v21, %v5720_v42  ;;  %v4520_v17 = vpop.f32.mrb[30].mxu1 }
 0xc2f   : > { %v3420_v33 = vadd.f32 %v4520_v17, %v3325_v39  ;;  %v3414_v6 = vpop.f32.mrb[31].mxu1  ;;  %v3431_v22 = vsel %vm416_vm0, %v6196_v27, 0.0 }
 0xc30   : > { %v3415_v41 = vadd.f32 %v3414_v6, %v3325_v39  ;;  %3432 = vadd.xlane.f32.xlu1 %v3431_v22  ;;  %v3428_v51 = vsel %vm416_vm0, %v6199_v60, 0.0  ;;  %v3491_v39 = vrot.slane %v6238_v44, %v5285_v59  ;;  %v3624_v59 = vld [vmem:[%s6344_s9] sm:$0xff] }
 0xc31   : > { %v6206_v11 = vadd.f32 %v3420_v33, %v5727_v4  ;;  %3429 = vadd.xlane.f32.xlu0 %v3428_v51 }
 0xc32   : > { %v6209_v52 = vadd.f32 %v3415_v41, %v5730_v63 }
 0xc33   : > { %v3437_v42 = vsel %vm416_vm0, %v6206_v11, 0.0 }
 0xc34   : > { %3438 = vadd.xlane.f32.xlu1 %v3437_v42  ;;  %v3434_v10 = vsel %vm416_vm0, %v6209_v52, 0.0 }
 0xc35   : > { %3435 = vadd.xlane.f32.xlu0 %v3434_v10  ;;  %v3625_v10 = vld [vmem:[%s6344_s9 + $0x8] sm:$0xff] }
 0xcbd   : > { %v3433_v29 = vpop.xlane.xlu1 %3432 }
 0xcbe   : > { %v3441_v54 = vmul.f32 0.03125, %v3433_v29  ;;  %v3430_v32 = vpop.xlane.xlu0 %3429  ;;  %v4789_v29 = vpack.c.bf16 %v3625_v10, %v3624_v59 }
 0xcbf   : > { %v3440_v49 = vmul.f32 0.03125, %v3430_v32  ;;  %v3627_v32 = vld [vmem:[%s6344_s9 + $0x18] sm:$0xff] }
 0xcc0   : > { %v3445_v55 = vsub.f32 %v6196_v27, %v3441_v54  ;;  %4790 = vmatprep.subr.bf16.mxu1 %v4789_v29  ;;  %v3626_v54 = vld [vmem:[%s6344_s9 + $0x10] sm:$0xff] }
 0xcc1   : > { %v3444_v4 = vsub.f32 %v6199_v60, %v3440_v49  ;;  %v3439_v45 = vpop.xlane.xlu1 %3438  ;;  %4792 = vmatpush3.bf16.msra.mxu1 %v4789_v29  ;;  %v4793_v49 = vpack.c.bf16 %v3627_v32, %v3626_v54 }
 0xcc2   : > { %v3443_v38 = vmul.f32 0.03125, %v3439_v45  ;;  %v3436_v63 = vpop.xlane.xlu0 %3435  ;;  %v3449_v46 = vmul.f32 %v3445_v55, %v3445_v55 }
 0xcc3   : > { %v3442_v48 = vmul.f32 0.03125, %v3436_v63  ;;  %v3448_v28 = vmul.f32 %v3444_v4, %v3444_v4  ;;  %4794 = vmatprep.subr.bf16.mxu1 %v4793_v49  ;;  %v3631_v63 = vld [vmem:[%s6344_s9 + $0x38] sm:$0xff] }
 0xcc4   : > { %v3447_v14 = vsub.f32 %v6206_v11, %v3443_v38  ;;  %v3455_v30 = vsel %vm416_vm0, %v3449_v46, 0.0  ;;  %v3630_v38 = vld [vmem:[%s6344_s9 + $0x30] sm:$0xff] }
 0xcc5   : > { %v3446_v25 = vsub.f32 %v6209_v52, %v3442_v48  ;;  %3456 = vadd.xlane.f32.xlu1 %v3455_v30  ;;  %v3452_v13 = vsel %vm416_vm0, %v3448_v28, 0.0  ;;  %4796 = vmatpush3.bf16.msra.mxu1 %v4793_v49  ;;  %v4801_v46 = vpack.c.bf16 %v3631_v63, %v3630_v38  ;;  %v3957_v48 = vld [vmem:[%s6343_s8] ss:$0 sm:$0xff] }
 0xcc6   : > { %3453 = vadd.xlane.f32.xlu0 %v3452_v13  ;;  %v3451_v35 = vmul.f32 %v3447_v14, %v3447_v14 }
 0xcc7   : > { %v3450_v62 = vmul.f32 %v3446_v25, %v3446_v25 }
 0xcc8   : > { %v3461_v12 = vsel %vm416_vm0, %v3451_v35, 0.0 }
 0xcc9   : > { %3462 = vadd.xlane.f32.xlu1 %v3461_v12  ;;  %v3458_v3 = vsel %vm416_vm0, %v3450_v62, 0.0 }
 0xcca   : > { %3459 = vadd.xlane.f32.xlu0 %v3458_v3 }
 0xd52   : > { %v3457_v7 = vpop.xlane.xlu1 %3456 }
 0xd53   : > { %v3465_v16 = vmul.f32 0.03125, %v3457_v7  ;;  %v3454_v1 = vpop.xlane.xlu0 %3453 }
 0xd54   : > { %v3464_v5 = vmul.f32 0.03125, %v3454_v1 }
 0xd55   : > { %v3469_v43 = vadd.f32 1e-06, %v3465_v16 }
 0xd56   : > { %v3468_v9 = vadd.f32 1e-06, %v3464_v5  ;;  %v3463_v24 = vpop.xlane.xlu1 %3462 }
 0xd57   : > { %5014 = vrsqrt.f32 %v3469_v43  ;;  %v3467_v34 = vmul.f32 0.03125, %v3463_v24  ;;  %v3460_v0 = vpop.xlane.xlu0 %3459 }
 0xd58   : > { %5016 = vrsqrt.f32 %v3468_v9  ;;  %v3466_v2 = vmul.f32 0.03125, %v3460_v0 }
 0xd59   : > { %v3471_v20 = vadd.f32 1e-06, %v3467_v34 }
 0xd5a   : > { %v3470_v26 = vadd.f32 1e-06, %v3466_v2 }
 0xd5b   : > { %5018 = vrsqrt.f32 %v3471_v20 }
 0xd5c   : > { %5020 = vrsqrt.f32 %v3470_v26 }
 0xd61   : > { %v5015_v61 = vpop.eup %5014 }
 0xd62   : > { %v5017_v58 = vpop.eup %5016  ;;  %v3477_v47 = vmul.f32 %v5015_v61, %v3445_v55  ;;  %v3628_v55 = vld [vmem:[%s6344_s9 + $0x20] sm:$0xff]  ;;  %v3635_v61 = vrot.slane %v6238_v44, %v5317_v18 }
 0xd63   : > { %v3476_v23 = vmul.f32 %v5017_v58, %v3444_v4  ;;  %v3629_v4 = vld [vmem:[%s6344_s9 + $0x28] sm:$0xff] }
 0xd64   : > { %v3485_v31 = vmul.f32 %v3483_v8, %v3477_v47  ;;  %v4797_v45 = vpack.c.bf16 %v3629_v4, %v3628_v55 }
 0xd65   : > { %v5019_v37 = vpop.eup %5018  ;;  %v3484_v40 = vmul.f32 %v3483_v8, %v3476_v23 }
 0xd66   : > { %v5021_v21 = vpop.eup %5020  ;;  %v3479_v17 = vmul.f32 %v5019_v37, %v3447_v14  ;;  %v3493_v22 = vadd.f32 %v3491_v39, %v3485_v31  ;;  %4798 = vmatprep.subr.bf16.mxu1 %v4797_v45 }
 0xd67   : > { %v3492_v33 = vadd.f32 %v3491_v39, %v3484_v40  ;;  %v3478_v6 = vmul.f32 %v5021_v21, %v3446_v25  ;;  %4800 = vmatpush3.bf16.msra.mxu1 %v4797_v45 }
 0xd68   : > { %v3487_v41 = vmul.f32 %v3483_v8, %v3479_v17  ;;  %4802 = vmatprep.subr.bf16.mxu1 %v4801_v46 }
 0xd69   : > { %4529 = vmatprep.mubr.msk.f32.mxu0 %vm416_vm0, %v3492_v33  ;;  %v3486_v51 = vmul.f32 %v3483_v8, %v3478_v6 }
 0xd6a   : > { %4530 = vmatmul.mubr.msk.f32.vlgmr.msra.gmra.mrb[40].mxu0 %vm416_vm0, %v3493_v22  ;;  %v3495_v42 = vadd.f32 %v3491_v39, %v3487_v41 }
 0xd6b   : > { %v3494_v56 = vadd.f32 %v3491_v39, %v3486_v51  ;;  %4804 = vmatpush3.bf16.msra.mxu1 %v4801_v46 }
 0xd6d   : > { %4532 = vmatprep.mubr.msk.f32.mxu0 %vm416_vm0, %v3494_v56 }
 0xd6e   : > { %4533 = vmatmul.mubr.msk.f32.gmra.mrb[42].mxu0 %vm416_vm0, %v3495_v42 }
 0xe3d   : > { %v4531_v28 = vpop.f32.mrb[40].mxu0 }
 0xe3e   : > { %v3591_v14 = vadd.f32 %v4531_v28, %v3957_v48  ;;  %v3585_v30 = vpop.f32.mrb[41].mxu0 }
 0xe3f   : > { %v3586_v25 = vadd.f32 %v3957_v48, %v3585_v30 }
 0xe40   : > { %v3609_v13 = vmul.f32 0.70710677, %v3591_v14  ;;  %v3605_v1 = vmul.f32 0.5, %v3591_v14 }
 0xe41   : > { %v3608_v35 = vmul.f32 0.70710677, %v3586_v25  ;;  %v4534_v62 = vpop.f32.mrb[42].mxu0  ;;  %v3604_v7 = vmul.f32 0.5, %v3586_v25 }
 0xe42   : > { %5022 = verf.f32 %v3609_v13  ;;  %v3601_v12 = vadd.f32 %v4534_v62, %v3957_v48  ;;  %v3595_v3 = vpop.f32.mrb[43].mxu0 }
 0xe43   : > { %5024 = verf.f32 %v3608_v35  ;;  %v3596_v50 = vadd.f32 %v3957_v48, %v3595_v3 }
 0xe44   : > { %v3611_v53 = vmul.f32 0.70710677, %v3601_v12  ;;  %v3607_v20 = vmul.f32 0.5, %v3601_v12 }
 0xe45   : > { %v3610_v15 = vmul.f32 0.70710677, %v3596_v50  ;;  %v3606_v0 = vmul.f32 0.5, %v3596_v50 }
 0xe46   : > { %5026 = verf.f32 %v3611_v53 }
 0xe47   : > { %5028 = verf.f32 %v3610_v15 }
 0xe4c   : > { %v5023_v57 = vpop.eup %5022 }
 0xe4d   : > { %v5025_v19 = vpop.eup %5024  ;;  %v3617_v36 = vadd.f32 1.0, %v5023_v57 }
 0xe4e   : > { %v3616_v16 = vadd.f32 1.0, %v5025_v19 }
 0xe4f   : > { %v3621_v24 = vmul.f32 %v3617_v36, %v3605_v1 }
 0xe50   : > { %v5027_v5 = vpop.eup %5026  ;;  %v3620_v43 = vmul.f32 %v3616_v16, %v3604_v7 }
 0xe51   : > { %v5029_v9 = vpop.eup %5028  ;;  %v3619_v34 = vadd.f32 1.0, %v5027_v5 }
 0xe52   : > { %v3618_v2 = vadd.f32 1.0, %v5029_v9  ;;  %4551 = vmatprep.mubr.msk.f32.mxu1 %vm3636_vm2, %v3620_v43 }
 0xe53   : > { %4552 = vmatmul.mubr.msk.f32.vlgmr.msra.gmra.mrb[32].mxu1 %vm3636_vm2, %v3621_v24  ;;  %v3623_v8 = vmul.f32 %v3619_v34, %v3607_v20 }
 0xe54   : > { %v3622_v26 = vmul.f32 %v3618_v2, %v3606_v0 }
 0xe56   : > { %4554 = vmatprep.mubr.msk.f32.mxu1 %vm3636_vm2, %v3622_v26 }
 0xe57   : > { %4555 = vmatmul.mubr.msk.f32.gmra.mrb[34].mxu1 %vm3636_vm2, %v3623_v8 }
 0xf26   : > { %v4553_v58 = vpop.f32.mrb[32].mxu1 }
 0xf27   : > { %v3721_v47 = vadd.f32 %v4553_v58, %v3635_v61  ;;  %v3715_v23 = vpop.f32.mrb[33].mxu1 }
 0xf28   : > { %v3716_v39 = vadd.f32 %v3715_v23, %v3635_v61 }
 0xf29   : > { %v3735_v31 = vadd.f32 %v3721_v47, %v6196_v27 }
 0xf2a   : > { %v3734_v37 = vadd.f32 %v3716_v39, %v6199_v60  ;;  %v4556_v40 = vpop.f32.mrb[34].mxu1 }
 0xf2b   : > { %3739 = vst.msk [vmem:[%s379_s14 + $0x8] sm:$0xff] %vm416_vm0, %v3735_v31  ;;  %v3731_v21 = vadd.f32 %v4556_v40, %v3635_v61  ;;  %v3725_v17 = vpop.f32.mrb[35].mxu1 }
 0xf2c   : > { %3738 = vst.msk [vmem:[%s379_s14] sm:$0xff] %vm416_vm0, %v3734_v37  ;;  %v3726_v18 = vadd.f32 %v3725_v17, %v3635_v61 }
 0xf2d   : > { %v3737_v44 = vadd.f32 %v3731_v21, %v6206_v11 }
 0xf2e   : > { %v3736_v27 = vadd.f32 %v3726_v18, %v6209_v52 }
 0xf2f   : > { %3741 = vst.msk [vmem:[%s379_s14 + $0x18] sm:$0xff] %vm416_vm0, %v3737_v44 }
 0xf30   : > { %3740 = vst.msk [vmem:[%s379_s14 + $0x10] sm:$0xff] %vm416_vm0, %v3736_v27 }
 0xf31   : > { %5047 = shalt.err (!%p5044_p3)
}
 0xf32   : > { %s5048_s12 = scalar_lea.hbm %s6287_s25, 512  ;;  %s5052_s16 = scalar_lea.hbm %s6346_s11, 1024 }
 0xf33   : > { %p5049_p4 = scmp.ne.s32.totalorder %s6287_s25, %s5048_s12  ;;  %p5053_p9 = scmp.lt.u32.totalorder %s6287_s25, %s6346_s11 }
 0xf34   : > { %p5054_p10 = scmp.lt.u32.totalorder %s5052_s16, %s5048_s12  ;;  %p5056_p12 = scmp.lt.u32.totalorder %s5048_s12, %s6287_s25 }
 0xf35   : > { %p5050_p7 = pnand %p5049_p4, %p5199_p5 }
 0xf36   : > { %p5055_p11 = por %p5054_p10, %p5053_p9 }
 0xf37   : > { %p5051_p8 = pneg %p5050_p7 }
 0xf38   : > { %p5057_p13 = por %p5056_p12, %p5055_p11 }
 0xf3a   : > { %p5058_p0 = pnand %p5057_p13, %p5051_p8 }
 0xf3c   : > { %5061 = shalt.err (!%p5058_p0)
}
 0xf3d   : > { %s5099_s0 = smov 128   ;;  %s5100_s26 = smov 8  }
 0xf3e   : > { %4829 = dma.vmem_to_hbm [thread:$0]  (%p5199_p5), %s6289_s15, 512, %s6287_s25, %s6294_s21, %s5099_s0, %s5099_s0, %s5100_s26  }
 0xf3f PF: > { %p4835_p1 = scmp.ge.s32.totalorder %s5096_s20, 2  ;;  %s3771_s29 = sand.u32 1, %s5084_s17  }
 0xf40   : > { %s3772_s30 = scalar_lea.sflag [#allocation3], %s3771_s29 }
 0xf41   : > { %p4832_p2 = pnand %p4835_p1, %p5203_p6 }
 0xf43   : > { %5079 = dma.done.wait (!%p4832_p2), %s3772_s30, 512  }
 0xf44   : > { %5081 = vsyncadd (!%p4832_p2), %s3772_s30, 4294966784  ;;  %s6354_s12 = sld [smem:[#allocation5_spill]]  ;;  %p21_p3 = scmp.ge.s32.totalorder %s5186_s23, 4  }
 0xf45   : > { %s6355_s17 = smov %s5088_s18  ;;  %s6356_s18 = smov %s5092_s19 }
 0xf46   : > { %s6358_s20 = smov %s5186_s23  ;;  %23 = sbr.rel (!%p21_p3) target bundleno = 5 (0x5), region = 100 }
 0xf4a   : > { %s6357_s19 = smov %s6354_s12 }
 0xf4d   :  { %3777 = vsyncpa [#allocation3], 1 }
 0xf4e   :  { %3779 = vsyncpa [#allocation3 + $0x1], 1 }

</bundles_post_ra>
